<compile_context>
chip_gen: v7x
topology: tpu7x:2x2x1
jax: 0.10.0
libtpu: 0.0.40
codegen_flags: <defaults>
</compile_context>

<pallas_src>
import jax
import jax.numpy as jnp
from jax.experimental import pallas as pl
from jax.experimental.pallas import tpu as pltpu


# ----------------------------- small helpers --------------------------------

def _round_up(n, m):
    return ((n + m - 1) // m) * m


def _cdiv(a, b):
    return (a + b - 1) // b


def _pad2(a, rows, cols):
    return jnp.pad(a, ((0, rows - a.shape[0]), (0, cols - a.shape[1])))


def _vmem_capacity_bytes():
    """Physical VMEM of the current chip (v5e/v6e: 128 MiB, v7x: 64 MiB/TC)."""
    try:
        cap = getattr(pltpu.get_tpu_info(), "vmem_capacity_bytes", None)
        if cap:
            return int(cap)
    except Exception:
        pass
    return 64 * 2**20  # conservative default (v7x per-TC)


# --------------------------------- kernel ------------------------------------

def arn_kernel(x_ref, ws_ref, bs_ref, w2_ref, b2_ref, wo_ref, bo_ref, out_ref):
    x = x_ref[...]

    # layer 1: fused attention + residual_1 -> relu     (x @ (wa+w1) + (ba+b1))
    h = jnp.dot(x, ws_ref[...], preferred_element_type=jnp.float32) + bs_ref[...]
    h = jnp.maximum(h, 0.0)

    # layer 2: residual_2 with identity folded in -> relu  (h @ (w2+I) + b2)
    h2 = jnp.dot(h.astype(w2_ref.dtype), w2_ref[...],
                 preferred_element_type=jnp.float32) + b2_ref[...]
    h2 = jnp.maximum(h2, 0.0)

    # output layer
    out = jnp.dot(h2.astype(wo_ref.dtype), wo_ref[...],
                  preferred_element_type=jnp.float32) + bo_ref[...]
    out_ref[...] = out.astype(out_ref.dtype)


# ----------------------- host-side param prep (hoisted) -----------------------

def prepare_params(params, *, compute_dtype=jnp.bfloat16):
    """Fuse + pad + cast the weights ONCE.  Call once per model, reuse per forward."""
    in_dim, hid = params["wa"].shape
    ncls = params["wo"].shape[1]
    in_p = _round_up(in_dim, 128)
    hid_p = _round_up(hid, 128)
    ncls_p = _round_up(ncls, 128)

    w_sum = params["wa"] + params["w1"]                               # att + res1
    b_sum = params["ba"] + params["b1"]
    w2p = params["w2"] + jnp.eye(hid, dtype=params["w2"].dtype)       # h + h @ w2

    return dict(
        ws=_pad2(w_sum, in_p, hid_p).astype(compute_dtype),
        bs=_pad2(b_sum, 1, hid_p),                                    # biases stay f32
        w2=_pad2(w2p, hid_p, hid_p).astype(compute_dtype),
        b2=_pad2(params["b2"], 1, hid_p),
        wo=_pad2(params["wo"], hid_p, ncls_p).astype(compute_dtype),
        bo=_pad2(params["bo"], 1, ncls_p),
        in_dim=in_dim, ncls=ncls, compute_dtype=jnp.dtype(compute_dtype),
    )


# ----------------------------- pallas_call builder ---------------------------

def _const_spec(shape, single_buffer):
    idx = lambda i: (0, 0)
    if single_buffer:
        try:
            # grid-invariant block -> no need for a second (never used) buffer
            return pl.BlockSpec(shape, idx, pipeline_mode=pl.Buffered(1))
        except TypeError:
            pass
    return pl.BlockSpec(shape, idx)


def _build_arn_call(tile_b, in_p, hid_p, ncls_p, out_dtype, n_steps,
                    vmem_limit, single_buffer):
    in_specs = [
        pl.BlockSpec((tile_b, in_p), lambda i: (i, 0)),          # x tile
        _const_spec((in_p, hid_p), single_buffer),               # wa + w1
        _const_spec((1, hid_p), single_buffer),                  # ba + b1
        _const_spec((hid_p, hid_p), single_buffer),              # w2 + I
        _const_spec((1, hid_p), single_buffer),                  # b2
        _const_spec((hid_p, ncls_p), single_buffer),             # wo
        _const_spec((1, ncls_p), single_buffer),                 # bo
    ]
    return pl.pallas_call(
        arn_kernel,
        out_shape=jax.ShapeDtypeStruct((n_steps * tile_b, ncls_p), out_dtype),
        grid_spec=pltpu.PrefetchScalarGridSpec(
            num_scalar_prefetch=0,
            grid=(n_steps,),
            in_specs=in_specs,
            out_specs=pl.BlockSpec((tile_b, ncls_p), lambda i: (i, 0)),
        ),
        compiler_params=pltpu.CompilerParams(
            dimension_semantics=("parallel",),
            vmem_limit_bytes=vmem_limit,
        ),
    )


# --------------------------------- forward ------------------------------------

def arn_forward(x, prepared, *, tile_b=None):
    """x: [B, input_size] float32.  prepared: output of prepare_params()."""
    B, in_dim = x.shape
    assert in_dim == prepared["in_dim"]
    compute_dtype = prepared["compute_dtype"]
    in_p, hid_p = prepared["ws"].shape
    ncls_p = prepared["wo"].shape[1]
    ncls = prepared["ncls"]

    # ---- batch tiling: large tiles (amortize ~0.35 us/step), sublane-pack aligned,
    #      but keep >= 2 grid steps when batch allows so both v7x TCs are used.
    itemsize = jnp.dtype(compute_dtype).itemsize
    pack = 8 * max(1, 4 // itemsize)          # 8 rows f32, 16 bf16, 32 int8/fp8
    b_aligned = _round_up(B, pack)
    if tile_b is None:
        tile_b = 512
    tile_b = min(_round_up(max(tile_b, pack), pack), b_aligned)
    if b_aligned >= 2 * pack:                 # keep the "parallel" axis length >= 2
        tile_b = min(tile_b, _round_up(_cdiv(b_aligned, 2), pack))
    Bp = _round_up(B, tile_b)
    n_steps = Bp // tile_b

    # only the activation is padded/cast per call (weights were prepared once)
    xp = jnp.pad(x, ((0, Bp - B), (0, in_p - in_dim))).astype(compute_dtype)

    # ---- VMEM budget: conservative estimate, clamped to ~85% of this chip's VMEM
    wbytes = (in_p * hid_p + hid_p * hid_p + hid_p * ncls_p) * itemsize \
             + (2 * hid_p + ncls_p) * 4
    iobytes = tile_b * in_p * itemsize + tile_b * ncls_p * 4
    scratch = 4 * tile_b * hid_p * 4          # f32 h / h2 intermediates + slack
    need = 2 * wbytes + 4 * iobytes + scratch
    vmem_limit = int(min(max(need, 16 * 2**20),
                         (_vmem_capacity_bytes() * 85) // 100))

    args = (xp, prepared["ws"], prepared["bs"], prepared["w2"], prepared["b2"],
            prepared["wo"], prepared["bo"])
    try:
        out = _build_arn_call(tile_b, in_p, hid_p, ncls_p, x.dtype, n_steps,
                              vmem_limit, single_buffer=True)(*args)
    except Exception:
        # pipeline_mode=pl.Buffered(1) not supported by this jax build — fall back
        # to default double-buffered grid-invariant weights (identical results).
        out = _build_arn_call(tile_b, in_p, hid_p, ncls_p, x.dtype, n_steps,
                              vmem_limit, single_buffer=False)(*args)

    return out[:B, :ncls]


# ------------------------------ params / reference ----------------------------

def make_params(key, input_size, hidden_size, num_classes):
    ks = jax.random.split(key, 8)

    def lin(kw, kb, fan_in, fan_out):
        # PyTorch-style uniform init bound; weight stored [in, out] (pre-transposed)
        bound = 1.0 / jnp.sqrt(fan_in)
        w = jax.random.uniform(kw, (fan_in, fan_out), jnp.float32, -bound, bound)
        b = jax.random.uniform(kb, (1, fan_out), jnp.float32, -bound, bound)
        return w, b

    wa, ba = lin(ks[0], ks[1], input_size, hidden_size)
    w1, b1 = lin(ks[2], ks[3], input_size, hidden_size)
    w2, b2 = lin(ks[4], ks[5], hidden_size, hidden_size)
    wo, bo = lin(ks[6], ks[7], hidden_size, num_classes)
    return dict(wa=wa, ba=ba, w1=w1, b1=b1, w2=w2, b2=b2, wo=wo, bo=bo)


def arn_reference(x, p):
    att = x @ p["wa"] + p["ba"]
    res1 = x @ p["w1"] + p["b1"]
    h = jnp.maximum(att + res1, 0.0)
    res2 = h @ p["w2"] + p["b2"]
    h2 = jnp.maximum(h + res2, 0.0)
    return h2 @ p["wo"] + p["bo"]


if __name__ == "__main__":
    key = jax.random.PRNGKey(0)
    k_x, k_x2, k_p = jax.random.split(key, 3)

    input_size, hidden_size, num_classes = 32, 32, 16
    params = make_params(k_p, input_size, hidden_size, num_classes)

    # Hoisted weight prep: built once per (model, dtype), reused by every forward.
    prep_f32 = prepare_params(params, compute_dtype=jnp.float32)
    prep_bf16 = prepare_params(params, compute_dtype=jnp.bfloat16)   # default path

    batch = 256
    x = jax.random.normal(k_x, (batch, input_size), jnp.float32)
    ref = arn_reference(x, params)

    # 1) f32 compute path; batch grid stays >= 2 steps (both v7x TensorCores)
    out = jax.block_until_ready(arn_forward(x, prep_f32))
    assert out.shape == (batch, num_classes)
    assert jnp.allclose(out, ref, atol=1e-4, rtol=1e-4)

    # 2) ragged batch (exercises batch padding path), f32
    x2 = jax.random.normal(k_x2, (20, input_size), jnp.float32)
    ref2 = arn_reference(x2, params)
    out2 = jax.block_until_ready(arn_forward(x2, prep_f32))
    assert out2.shape == (20, num_classes)
    assert jnp.allclose(out2, ref2, atol=1e-4, rtol=1e-4)

    # 3) default bf16 operands / f32 accumulation (bf16 MXU peak on v5e/v6e/v7x)
    out_bf = jax.block_until_ready(arn_forward(x, prep_bf16))
    assert out_bf.shape == (batch, num_classes)
    assert jnp.allclose(out_bf, ref, atol=1e-1, rtol=1e-1)

    # 4) ragged bf16 batch (tile rounded to the 16-row bf16 sublane packing)
    out2_bf = jax.block_until_ready(arn_forward(x2, prep_bf16))
    assert out2_bf.shape == (20, num_classes)
    assert jnp.allclose(out2_bf, ref2, atol=1e-1, rtol=1e-1)

    print("KERNEL_OK")
</pallas_src>

<mosaic_0001>
module attributes {stable_mosaic.version = 11 : i64} {
  func.func @arn_kernel(%arg0: i32, %arg1: memref<128x128xf32, #tpu.memory_space<vmem>>, %arg2: memref<128x128xf32, #tpu.memory_space<vmem>>, %arg3: memref<1x128xf32, #tpu.memory_space<vmem>>, %arg4: memref<128x128xf32, #tpu.memory_space<vmem>>, %arg5: memref<1x128xf32, #tpu.memory_space<vmem>>, %arg6: memref<128x128xf32, #tpu.memory_space<vmem>>, %arg7: memref<1x128xf32, #tpu.memory_space<vmem>>, %arg8: memref<128x128xf32, #tpu.memory_space<vmem>>) attributes {dimension_semantics = [#tpu.dimension_semantics<parallel>], iteration_bounds = array<i64: 2>, scalar_prefetch = 0 : i64, scratch_operands = 0 : i64, tpu.core_type = #tpu.core_type<tc>, window_params = [{transform_indices = @transform_0, window_bounds = array<i64: 128, 128>}, {pipeline_mode = #tpu.pipeline_mode<synchronous>, transform_indices = @transform_1, window_bounds = array<i64: 128, 128>}, {pipeline_mode = #tpu.pipeline_mode<synchronous>, transform_indices = @transform_2, window_bounds = array<i64: 1, 128>}, {pipeline_mode = #tpu.pipeline_mode<synchronous>, transform_indices = @transform_3, window_bounds = array<i64: 128, 128>}, {pipeline_mode = #tpu.pipeline_mode<synchronous>, transform_indices = @transform_4, window_bounds = array<i64: 1, 128>}, {pipeline_mode = #tpu.pipeline_mode<synchronous>, transform_indices = @transform_5, window_bounds = array<i64: 128, 128>}, {pipeline_mode = #tpu.pipeline_mode<synchronous>, transform_indices = @transform_6, window_bounds = array<i64: 1, 128>}, {transform_indices = @transform_7, window_bounds = array<i64: 128, 128>}]} {
    %c0 = arith.constant 0 : index
    %c0_0 = arith.constant 0 : index
    %0 = vector.load %arg1[%c0, %c0_0] : memref<128x128xf32, #tpu.memory_space<vmem>>, vector<128x128xf32>
    %c0_1 = arith.constant 0 : index
    %c0_2 = arith.constant 0 : index
    %1 = vector.load %arg2[%c0_1, %c0_2] : memref<128x128xf32, #tpu.memory_space<vmem>>, vector<128x128xf32>
    %cst = arith.constant dense<0.000000e+00> : vector<128x128xf32>
    %2 = tpu.matmul %0, %1, %cst {dimension_numbers = #tpu.dot_dimension_numbers<[1], [0], [0], [1], [0, 0, 1, 1], [], []>} : vector<128x128xf32>, vector<128x128xf32>, vector<128x128xf32> -> vector<128x128xf32>
    %c0_3 = arith.constant 0 : index
    %c0_4 = arith.constant 0 : index
    %3 = vector.load %arg3[%c0_3, %c0_4] : memref<1x128xf32, #tpu.memory_space<vmem>>, vector<1x128xf32>
    %4 = vector.broadcast %3 : vector<1x128xf32> to vector<128x128xf32>
    %5 = arith.addf %2, %4 : vector<128x128xf32>
    %cst_5 = arith.constant 0.000000e+00 : f32
    %6 = vector.broadcast %cst_5 : f32 to vector<128x128xf32>
    %7 = arith.maximumf %5, %6 : vector<128x128xf32>
    %c0_6 = arith.constant 0 : index
    %c0_7 = arith.constant 0 : index
    %8 = vector.load %arg4[%c0_6, %c0_7] : memref<128x128xf32, #tpu.memory_space<vmem>>, vector<128x128xf32>
    %cst_8 = arith.constant dense<0.000000e+00> : vector<128x128xf32>
    %9 = tpu.matmul %7, %8, %cst_8 {dimension_numbers = #tpu.dot_dimension_numbers<[1], [0], [0], [1], [0, 0, 1, 1], [], []>} : vector<128x128xf32>, vector<128x128xf32>, vector<128x128xf32> -> vector<128x128xf32>
    %c0_9 = arith.constant 0 : index
    %c0_10 = arith.constant 0 : index
    %10 = vector.load %arg5[%c0_9, %c0_10] : memref<1x128xf32, #tpu.memory_space<vmem>>, vector<1x128xf32>
    %11 = vector.broadcast %10 : vector<1x128xf32> to vector<128x128xf32>
    %12 = arith.addf %9, %11 : vector<128x128xf32>
    %cst_11 = arith.constant 0.000000e+00 : f32
    %13 = vector.broadcast %cst_11 : f32 to vector<128x128xf32>
    %14 = arith.maximumf %12, %13 : vector<128x128xf32>
    %c0_12 = arith.constant 0 : index
    %c0_13 = arith.constant 0 : index
    %15 = vector.load %arg6[%c0_12, %c0_13] : memref<128x128xf32, #tpu.memory_space<vmem>>, vector<128x128xf32>
    %cst_14 = arith.constant dense<0.000000e+00> : vector<128x128xf32>
    %16 = tpu.matmul %14, %15, %cst_14 {dimension_numbers = #tpu.dot_dimension_numbers<[1], [0], [0], [1], [0, 0, 1, 1], [], []>} : vector<128x128xf32>, vector<128x128xf32>, vector<128x128xf32> -> vector<128x128xf32>
    %c0_15 = arith.constant 0 : index
    %c0_16 = arith.constant 0 : index
    %17 = vector.load %arg7[%c0_15, %c0_16] : memref<1x128xf32, #tpu.memory_space<vmem>>, vector<1x128xf32>
    %18 = vector.broadcast %17 : vector<1x128xf32> to vector<128x128xf32>
    %19 = arith.addf %16, %18 : vector<128x128xf32>
    %c0_17 = arith.constant 0 : index
    %c0_18 = arith.constant 0 : index
    %20 = vector.load %arg8[%c0_17, %c0_18] : memref<128x128xf32, #tpu.memory_space<vmem>>, vector<128x128xf32>
    tpu.vector_store %arg8[%c0_17, %c0_18], %19 {strides = array<i32>} : memref<128x128xf32, #tpu.memory_space<vmem>>, vector<128x128xf32>,
    return
  }
  func.func @transform_0(%arg0: i32) -> (i32, i32) {
    %c0_i32 = arith.constant 0 : i32
    %c0_i32_0 = arith.constant 0 : i32
    return %arg0, %c0_i32 : i32, i32
  }
  func.func @transform_1(%arg0: i32) -> (i32, i32) {
    %c0_i32 = arith.constant 0 : i32
    %c0_i32_0 = arith.constant 0 : i32
    %c0_i32_1 = arith.constant 0 : i32
    return %c0_i32, %c0_i32_0 : i32, i32
  }
  func.func @transform_2(%arg0: i32) -> (i32, i32) {
    %c0_i32 = arith.constant 0 : i32
    %c0_i32_0 = arith.constant 0 : i32
    %c0_i32_1 = arith.constant 0 : i32
    return %c0_i32, %c0_i32_0 : i32, i32
  }
  func.func @transform_3(%arg0: i32) -> (i32, i32) {
    %c0_i32 = arith.constant 0 : i32
    %c0_i32_0 = arith.constant 0 : i32
    %c0_i32_1 = arith.constant 0 : i32
    return %c0_i32, %c0_i32_0 : i32, i32
  }
  func.func @transform_4(%arg0: i32) -> (i32, i32) {
    %c0_i32 = arith.constant 0 : i32
    %c0_i32_0 = arith.constant 0 : i32
    %c0_i32_1 = arith.constant 0 : i32
    return %c0_i32, %c0_i32_0 : i32, i32
  }
  func.func @transform_5(%arg0: i32) -> (i32, i32) {
    %c0_i32 = arith.constant 0 : i32
    %c0_i32_0 = arith.constant 0 : i32
    %c0_i32_1 = arith.constant 0 : i32
    return %c0_i32, %c0_i32_0 : i32, i32
  }
  func.func @transform_6(%arg0: i32) -> (i32, i32) {
    %c0_i32 = arith.constant 0 : i32
    %c0_i32_0 = arith.constant 0 : i32
    %c0_i32_1 = arith.constant 0 : i32
    return %c0_i32, %c0_i32_0 : i32, i32
  }
  func.func @transform_7(%arg0: i32) -> (i32, i32) {
    %c0_i32 = arith.constant 0 : i32
    %c0_i32_0 = arith.constant 0 : i32
    return %arg0, %c0_i32 : i32, i32
  }
}

module attributes {stable_mosaic.version = 11 : i64} {
  func.func @arn_kernel(%arg0: i32, %arg1: memref<128x128xf32, #tpu.memory_space<vmem>>, %arg2: memref<128x128xf32, #tpu.memory_space<vmem>>, %arg3: memref<1x128xf32, #tpu.memory_space<vmem>>, %arg4: memref<128x128xf32, #tpu.memory_space<vmem>>, %arg5: memref<1x128xf32, #tpu.memory_space<vmem>>, %arg6: memref<128x128xf32, #tpu.memory_space<vmem>>, %arg7: memref<1x128xf32, #tpu.memory_space<vmem>>, %arg8: memref<128x128xf32, #tpu.memory_space<vmem>>) attributes {dimension_semantics = [#tpu.dimension_semantics<parallel>], iteration_bounds = array<i64: 2>, scalar_prefetch = 0 : i64, scratch_operands = 0 : i64, tpu.core_type = #tpu.core_type<tc>, window_params = [{transform_indices = @transform_0, window_bounds = array<i64: 128, 128>}, {pipeline_mode = #tpu.pipeline_mode<synchronous>, transform_indices = @transform_1, window_bounds = array<i64: 128, 128>}, {pipeline_mode = #tpu.pipeline_mode<synchronous>, transform_indices = @transform_2, window_bounds = array<i64: 1, 128>}, {pipeline_mode = #tpu.pipeline_mode<synchronous>, transform_indices = @transform_3, window_bounds = array<i64: 128, 128>}, {pipeline_mode = #tpu.pipeline_mode<synchronous>, transform_indices = @transform_4, window_bounds = array<i64: 1, 128>}, {pipeline_mode = #tpu.pipeline_mode<synchronous>, transform_indices = @transform_5, window_bounds = array<i64: 128, 128>}, {pipeline_mode = #tpu.pipeline_mode<synchronous>, transform_indices = @transform_6, window_bounds = array<i64: 1, 128>}, {transform_indices = @transform_7, window_bounds = array<i64: 128, 128>}]} {
    %c0 = arith.constant 0 : index
    %c0_0 = arith.constant 0 : index
    %0 = vector.load %arg1[%c0, %c0_0] : memref<128x128xf32, #tpu.memory_space<vmem>>, vector<128x128xf32>
    %c0_1 = arith.constant 0 : index
    %c0_2 = arith.constant 0 : index
    %1 = vector.load %arg2[%c0_1, %c0_2] : memref<128x128xf32, #tpu.memory_space<vmem>>, vector<128x128xf32>
    %cst = arith.constant dense<0.000000e+00> : vector<128x128xf32>
    %2 = tpu.matmul %0, %1, %cst {dimension_numbers = #tpu.dot_dimension_numbers<[1], [0], [0], [1], [0, 0, 1, 1], [], []>} : vector<128x128xf32>, vector<128x128xf32>, vector<128x128xf32> -> vector<128x128xf32>
    %c0_3 = arith.constant 0 : index
    %c0_4 = arith.constant 0 : index
    %3 = vector.load %arg3[%c0_3, %c0_4] : memref<1x128xf32, #tpu.memory_space<vmem>>, vector<1x128xf32>
    %4 = vector.broadcast %3 : vector<1x128xf32> to vector<128x128xf32>
    %5 = arith.addf %2, %4 : vector<128x128xf32>
    %cst_5 = arith.constant 0.000000e+00 : f32
    %6 = vector.broadcast %cst_5 : f32 to vector<128x128xf32>
    %7 = arith.maximumf %5, %6 : vector<128x128xf32>
    %c0_6 = arith.constant 0 : index
    %c0_7 = arith.constant 0 : index
    %8 = vector.load %arg4[%c0_6, %c0_7] : memref<128x128xf32, #tpu.memory_space<vmem>>, vector<128x128xf32>
    %cst_8 = arith.constant dense<0.000000e+00> : vector<128x128xf32>
    %9 = tpu.matmul %7, %8, %cst_8 {dimension_numbers = #tpu.dot_dimension_numbers<[1], [0], [0], [1], [0, 0, 1, 1], [], []>} : vector<128x128xf32>, vector<128x128xf32>, vector<128x128xf32> -> vector<128x128xf32>
    %c0_9 = arith.constant 0 : index
    %c0_10 = arith.constant 0 : index
    %10 = vector.load %arg5[%c0_9, %c0_10] : memref<1x128xf32, #tpu.memory_space<vmem>>, vector<1x128xf32>
    %11 = vector.broadcast %10 : vector<1x128xf32> to vector<128x128xf32>
    %12 = arith.addf %9, %11 : vector<128x128xf32>
    %cst_11 = arith.constant 0.000000e+00 : f32
    %13 = vector.broadcast %cst_11 : f32 to vector<128x128xf32>
    %14 = arith.maximumf %12, %13 : vector<128x128xf32>
    %c0_12 = arith.constant 0 : index
    %c0_13 = arith.constant 0 : index
    %15 = vector.load %arg6[%c0_12, %c0_13] : memref<128x128xf32, #tpu.memory_space<vmem>>, vector<128x128xf32>
    %cst_14 = arith.constant dense<0.000000e+00> : vector<128x128xf32>
    %16 = tpu.matmul %14, %15, %cst_14 {dimension_numbers = #tpu.dot_dimension_numbers<[1], [0], [0], [1], [0, 0, 1, 1], [], []>} : vector<128x128xf32>, vector<128x128xf32>, vector<128x128xf32> -> vector<128x128xf32>
    %c0_15 = arith.constant 0 : index
    %c0_16 = arith.constant 0 : index
    %17 = vector.load %arg7[%c0_15, %c0_16] : memref<1x128xf32, #tpu.memory_space<vmem>>, vector<1x128xf32>
    %18 = vector.broadcast %17 : vector<1x128xf32> to vector<128x128xf32>
    %19 = arith.addf %16, %18 : vector<128x128xf32>
    %c0_17 = arith.constant 0 : index
    %c0_18 = arith.constant 0 : index
    %20 = vector.load %arg8[%c0_17, %c0_18] : memref<128x128xf32, #tpu.memory_space<vmem>>, vector<128x128xf32>
    tpu.vector_store %arg8[%c0_17, %c0_18], %19 {strides = array<i32>} : memref<128x128xf32, #tpu.memory_space<vmem>>, vector<128x128xf32>,
    return
  }
  func.func @transform_0(%arg0: i32) -> (i32, i32) {
    %c0_i32 = arith.constant 0 : i32
    %c0_i32_0 = arith.constant 0 : i32
    return %arg0, %c0_i32 : i32, i32
  }
  func.func @transform_1(%arg0: i32) -> (i32, i32) {
    %c0_i32 = arith.constant 0 : i32
    %c0_i32_0 = arith.constant 0 : i32
    %c0_i32_1 = arith.constant 0 : i32
    return %c0_i32, %c0_i32_0 : i32, i32
  }
  func.func @transform_2(%arg0: i32) -> (i32, i32) {
    %c0_i32 = arith.constant 0 : i32
    %c0_i32_0 = arith.constant 0 : i32
    %c0_i32_1 = arith.constant 0 : i32
    return %c0_i32, %c0_i32_0 : i32, i32
  }
  func.func @transform_3(%arg0: i32) -> (i32, i32) {
    %c0_i32 = arith.constant 0 : i32
    %c0_i32_0 = arith.constant 0 : i32
    %c0_i32_1 = arith.constant 0 : i32
    return %c0_i32, %c0_i32_0 : i32, i32
  }
  func.func @transform_4(%arg0: i32) -> (i32, i32) {
    %c0_i32 = arith.constant 0 : i32
    %c0_i32_0 = arith.constant 0 : i32
    %c0_i32_1 = arith.constant 0 : i32
    return %c0_i32, %c0_i32_0 : i32, i32
  }
  func.func @transform_5(%arg0: i32) -> (i32, i32) {
    %c0_i32 = arith.constant 0 : i32
    %c0_i32_0 = arith.constant 0 : i32
    %c0_i32_1 = arith.constant 0 : i32
    return %c0_i32, %c0_i32_0 : i32, i32
  }
  func.func @transform_6(%arg0: i32) -> (i32, i32) {
    %c0_i32 = arith.constant 0 : i32
    %c0_i32_0 = arith.constant 0 : i32
    %c0_i32_1 = arith.constant 0 : i32
    return %c0_i32, %c0_i32_0 : i32, i32
  }
  func.func @transform_7(%arg0: i32) -> (i32, i32) {
    %c0_i32 = arith.constant 0 : i32
    %c0_i32_0 = arith.constant 0 : i32
    return %arg0, %c0_i32 : i32, i32
  }
}

</mosaic_0001>

<bundles_post_ra>
// kernel: tpu_custom_call.1
= control target key start
LH: loop header
LB: loop body
LE: loop exit
PB: predicated region body
PF: predicated region fallthrough
CT: control target
= control target key end

     0   :  { %12 = vsyncpa [#allocation3], 0  ;;  %s2111_s0 = inlined_call_operand.hbm [shape: f32[256,128], index: 0, kind: input, shape index: {}]   ;;  %s2112_s1 = inlined_call_operand.hbm [shape: f32[128,128], index: 1, kind: input, shape index: {}]   ;;  %s2113_s2 = inlined_call_operand.vmem [shape: f32[1,128], index: 2, kind: input, shape index: {}]   ;;  %s2114_s3 = inlined_call_operand.hbm [shape: f32[128,128], index: 3, kind: input, shape index: {}]   ;;  %s2115_s4 = inlined_call_operand.vmem [shape: f32[1,128], index: 4, kind: input, shape index: {}]   ;;  %s2116_s5 = inlined_call_operand.hbm [shape: f32[128,128], index: 5, kind: input, shape index: {}]   ;;  %s2117_s6 = inlined_call_operand.vmem [shape: f32[1,128], index: 6, kind: input, shape index: {}]   ;;  %s2118_s7 = inlined_call_operand.hbm [shape: f32[256,128], index: 7, kind: output, shape index: {}]  }
   0x1   :  { %14 = vsyncpa [#allocation3 + $0x1], 0 }
   0x2   :  { %15 = vsyncpa [#allocation6], 0 }
   0x3   :  { %16 = vsyncpa [#allocation9], 0 }
   0x4   :  { %17 = vsyncpa [#allocation4], 0 }
   0x5   :  { %19 = vsyncpa [#allocation4 + $0x1], 0  ;;  %s1748_s24 = smov 0   ;;  %s1750_s25 = smov 0  }
   0x6   :  { %s1752_s26 = smov 0   ;;  %s1754_s27 = smov 0  }
   0x7 LB: > { %s1769_s28 = sadd.s32 4294967295, %s1697_s27   ;;  %s1027_s29 = sadd.s32 4294967294, %s1697_s27   ;;  %s1697_s27 = sphi %s1754_s27, %s2144_s27   ;;  %s1693_s26 = sphi %s1752_s26, %s2143_s26   ;;  %s1689_s25 = sphi %s1750_s25, %s2142_s25   ;;  %s1685_s24 = sphi %s1748_s24, %s2141_s24  }
   0x8   : > { %p45_p0 = scmp.ne.s32.totalorder %s1689_s25, %s1685_s24  ;;  %p2119_p1 = scmp.eq.s32.totalorder %s1769_s28, 0 }
   0x9   : > { %p201_p3 = scmp.eq.s32.totalorder %s1027_s29, 1  ;;  %p1028_p5 = scmp.ge.s32.totalorder %s1697_s27, 1 }
   0xa   : > { %p1778_p4 = por %p2119_p1, %p45_p0  ;;  %p208_p7 = scmp.lt.s32.totalorder %s1697_s27, 3 }
   0xb   : > { %p1783_p6 = por %p201_p3, %p45_p0  ;;  %s1699_s10 = smov [#allocation5]  }
   0xc   : > { %s2123_s30 = scalar_select %p1778_p4, 1, 0 }
   0xd   : > { %s2124_s8 = scalar_select %p1783_p6, 1, 0 }
   0xe   : > { %p1788_p8 = pnand %p1028_p5, %p208_p7  ;;  %s220_s11 = sshll.u32 %s1699_s10, 4  ;;  %s1792_s11 = int_to_ptr.vmem [resolvable:$true] %s220_s11 }
   0xf   : > { %2125 = sst [smem:[#allocation15_spill]] %s2124_s8  ;;  %s1700_s13 = smov [#allocation7]  }
  0x10   : > { %s2126_s9 = scalar_select %p1788_p8, 1, 0 }
  0x11   : > { %p1444_p9 = pneg %p1788_p8  ;;  %s236_s14 = sshll.u32 %s1700_s13, 4  ;;  %s1803_s14 = int_to_ptr.vmem [resolvable:$true] %s236_s14 }
  0x12   : > { %s1701_s15 = smov [#allocation8]   ;;  %s1509_s19 = scalar_lea.hbm %s2112_s1, 2048 }
  0x13   : > { %p1799_p11 = pnand %p1444_p9, %p2119_p1  ;;  %s1805_s16 = sshll.u32 %s1701_s15, 4  ;;  %s253_s16 = int_to_ptr.vmem [resolvable:$true] %s1805_s16 }
  0x14   : > { %p1510_p12 = scmp.ne.s32.totalorder %s2112_s1, %s1509_s19  ;;  %p1516_p5 = scmp.lt.u32.totalorder %s1509_s19, %s2112_s1 }
  0x15   : > { %p1815_p13 = pneg %p1799_p11 }
  0x17   : > { %p1512_p0 = pnand %p1815_p13, %p1510_p12 }
  0x19   : > { %p1513_p3 = pneg %p1512_p0 }
  0x1b   : > { %p1518_p7 = pnand %p1516_p5, %p1513_p3 }
  0x1d   : > { %1521 = shalt.err (!%p1518_p7)
}
  0x1e   : > { %s1522_s10 = scalar_lea.vmem %s1792_s11, 2048  ;;  %p1530_p2 = scmp.lt.s32.totalorder %s1792_s11, %s1792_s11 }
  0x1f   : > { %p1523_p9 = scmp.ne.s32.totalorder %s1792_s11, %s1522_s10  ;;  %p1531_p6 = scmp.lt.s32.totalorder %s1522_s10, %s1522_s10 }
  0x21   : > { %p1525_p10 = pnand %p1523_p9, %p1815_p13  ;;  %p1532_p12 = por %p1531_p6, %p1530_p2 }
  0x23   : > { %p1526_p1 = pneg %p1525_p10 }
  0x25   : > { %p1533_p0 = pnand %p1532_p12, %p1526_p1 }
  0x27   : > { %1536 = shalt.err (!%p1533_p0)
}
  0x28   : > { %s1702_s13 = smov 128   ;;  %s1703_s15 = smov 8  }
  0x29   : > { %1447 = dma.hbm_to_vmem [thread:$0]  (!%p1799_p11), %s2112_s1, 2048, %s1792_s11, [#allocation6], %s1702_s13, %s1702_s13, %s1703_s15  }
  0x2a   : > { %s1537_s21 = scalar_lea.hbm %s2114_s3, 2048 }
  0x2b   : > { %p1538_p1 = scmp.ne.s32.totalorder %s2114_s3, %s1537_s21  ;;  %p1544_p10 = scmp.lt.u32.totalorder %s1537_s21, %s2114_s3 }
  0x2d   : > { %p1540_p2 = pnand %p1538_p1, %p1815_p13 }
  0x2f   : > { %p1541_p6 = pneg %p1540_p2 }
  0x31   : > { %p1546_p3 = pnand %p1544_p10, %p1541_p6 }
  0x33   : > { %1549 = shalt.err (!%p1546_p3)
}
  0x34   : > { %s1550_s11 = scalar_lea.vmem %s1803_s14, 2048  ;;  %p1558_p12 = scmp.lt.s32.totalorder %s1803_s14, %s1803_s14 }
  0x35   : > { %p1551_p5 = scmp.ne.s32.totalorder %s1803_s14, %s1550_s11  ;;  %p1559_p0 = scmp.lt.s32.totalorder %s1550_s11, %s1550_s11 }
  0x37   : > { %p1553_p7 = pnand %p1551_p5, %p1815_p13  ;;  %p1560_p1 = por %p1559_p0, %p1558_p12 }
  0x39   : > { %p1554_p9 = pneg %p1553_p7 }
  0x3b   : > { %p1561_p2 = pnand %p1560_p1, %p1554_p9 }
  0x3d   : > { %1564 = shalt.err (!%p1561_p2)
}
  0x3e   : > { %1450 = dma.hbm_to_vmem [thread:$0]  (!%p1799_p11), %s2114_s3, 2048, %s1803_s14, [#allocation6], %s1702_s13, %s1702_s13, %s1703_s15  }
  0x3f   : > { %s1565_s20 = scalar_lea.hbm %s2116_s5, 2048 }
  0x40   : > { %p1566_p6 = scmp.ne.s32.totalorder %s2116_s5, %s1565_s20  ;;  %p1572_p5 = scmp.lt.u32.totalorder %s1565_s20, %s2116_s5 }
  0x42   : > { %p1568_p10 = pnand %p1566_p6, %p1815_p13 }
  0x44   : > { %p1569_p3 = pneg %p1568_p10 }
  0x46   : > { %p1574_p7 = pnand %p1572_p5, %p1569_p3 }
  0x48   : > { %1577 = shalt.err (!%p1574_p7)
}
  0x49   : > { %s1578_s11 = scalar_lea.vmem %s253_s16, 2048  ;;  %p1586_p1 = scmp.lt.s32.totalorder %s253_s16, %s253_s16 }
  0x4a   : > { %p1579_p9 = scmp.ne.s32.totalorder %s253_s16, %s1578_s11  ;;  %p1587_p2 = scmp.lt.s32.totalorder %s1578_s11, %s1578_s11 }
  0x4c   : > { %p1581_p12 = pnand %p1579_p9, %p1815_p13  ;;  %p1588_p4 = por %p1587_p2, %p1586_p1 }
  0x4e   : > { %p1582_p0 = pneg %p1581_p12 }
  0x50   : > { %p1589_p8 = pnand %p1588_p4, %p1582_p0 }
  0x52   : > { %1592 = shalt.err (!%p1589_p8)
}
  0x53   : > { %1453 = dma.hbm_to_vmem [thread:$0]  (!%p1799_p11), %s2116_s5, 2048, %s253_s16, [#allocation9], %s1702_s13, %s1702_s13, %s1703_s15  }
  0x54   : > { %s1888_s22 = sadd.s32 1, %s1697_s27   ;;  %s32_s17 = sadd.s32 1, %s1693_s26 }
  0x55   : > { %s29_s12 = ssub.s32 %s1697_s27, %s1888_s22  ;;  %p39_p8 = scmp.ne.s32.totalorder %s1693_s26, %s1689_s25 }
  0x56   : > { %p30_p4 = scmp.eq.s32.totalorder %s29_s12, 0  ;;  %p40_p13 = scmp.eq.s32.totalorder %s1697_s27, 0 }
  0x57   : > { %p1465_p6 = scmp.lt.s32.totalorder %s1697_s27, 2  ;;  %p2129_p3 = scmp.eq.s32.totalorder %s1769_s28, 1 }
  0x58   : > { %s1898_s18 = scalar_select %p30_p4, %s1693_s26, %s32_s17  }
  0x59   : > { %p41_p10 = por %p40_p13, %p39_p8  ;;  %p1902_p5 = por %p2129_p3, %p39_p8 }
  0x5a   : > { %s269_s20 = sand.u32 1, %s1693_s26   ;;  %s1050_s21 = sshll.u32 %s1697_s27, 11 }
  0x5b   : > { %s1033_s16 = sshll.u32 %s269_s20, 7  ;;  %s1911_s10 = scalar_lea.hbm %s2111_s0, %s1050_s21 }
  0x5c   : > { %s273_s11 = scalar_lea.vmem [#allocation2], %s1033_s16  ;;  %p1913_p11 = pnand %p1465_p6, %p41_p10 }
  0x5d   : > { %s280_s14 = sshll.u32 %s273_s11, 4  ;;  %s1919_s12 = scalar_lea.sflag [#allocation3], %s269_s20  ;;  %s1917_s14 = int_to_ptr.vmem [resolvable:$true] %s280_s14 }
  0x5e   : > { %s1593_s17 = scalar_lea.hbm %s1911_s10, 2048  ;;  %p1595_p9 = pneg %p1913_p11 }
  0x5f   : > { %p1594_p7 = scmp.ne.s32.totalorder %s1911_s10, %s1593_s17  ;;  %s1598_s23 = scalar_lea.hbm %s2111_s0, 4096 }
  0x60   : > { %p1599_p1 = scmp.lt.u32.totalorder %s1911_s10, %s2111_s0  ;;  %p1600_p2 = scmp.lt.u32.totalorder %s1598_s23, %s1593_s17 }
  0x61   : > { %p1596_p12 = pnand %p1595_p9, %p1594_p7  ;;  %p1602_p8 = scmp.lt.u32.totalorder %s1593_s17, %s1911_s10 }
  0x62   : > { %p1601_p4 = por %p1600_p2, %p1599_p1 }
  0x63   : > { %p1597_p0 = pneg %p1596_p12 }
  0x64   : > { %p1603_p13 = por %p1602_p8, %p1601_p4 }
  0x66   : > { %p1604_p6 = pnand %p1603_p13, %p1597_p0 }
  0x68   : > { %1607 = shalt.err (!%p1604_p6)
}
  0x69   : > { %s1608_s20 = scalar_lea.vmem %s1917_s14, 2048  ;;  %s1704_s21 = smov [#allocation2]  }
  0x6a   : > { %p1609_p10 = scmp.ne.s32.totalorder %s1917_s14, %s1608_s20  ;;  %s1613_s16 = sshll.u32 %s1704_s21, 4  ;;  %s1614_s16 = int_to_ptr.vmem [resolvable:$false] %s1613_s16 }
  0x6b   : > { %s1615_s29 = scalar_lea.vmem %s1614_s16, 4096  ;;  %p1616_p12 = scmp.lt.s32.totalorder %s1917_s14, %s1614_s16 }
  0x6c   : > { %p1611_p3 = pnand %p1609_p10, %p1595_p9  ;;  %p1617_p1 = scmp.lt.s32.totalorder %s1615_s29, %s1608_s20 }
  0x6e   : > { %p1612_p7 = pneg %p1611_p3  ;;  %p1618_p2 = por %p1617_p1, %p1616_p12 }
  0x70   : > { %p1619_p4 = pnand %p1618_p2, %p1612_p7 }
  0x72   : > { %1622 = shalt.err (!%p1619_p4)
}
  0x73   : > { %1457 = dma.hbm_to_vmem [thread:$0]  (!%p1913_p11), %s1911_s10, 2048, %s1917_s14, %s1919_s12, %s1702_s13, %s1702_s13, %s1703_s15  }
  0x74   : > { %p2132_p9 = scmp.ne.s32.totalorder %s2126_s9, 0 }
  0x75   : > { %s1953_s17 = sand.u32 (!%p2132_p9), 1, %s1689_s25   ;;  %p2133_p0 = scmp.ne.s32.totalorder (!%p2132_p9), %s2123_s30, 0 }
  0x76   : > { %292 = sbr.rel (%p2132_p9) target bundleno = 862 (0x35e), region = 48  ;;  %s1037_s23 = sshll.u32 (!%p2132_p9), %s1953_s17, 7 }
  0x77   : > { %s295_s11 = scalar_lea.sflag (!%p2132_p9), [#allocation3], %s1953_s17  ;;  %s1959_s8 = scalar_lea.vmem (!%p2132_p9), [#allocation2], %s1037_s23 }
  0x7d   : > { %1668 = dma.done.wait (%p2133_p0), %s295_s11, 2048  }
  0x7e   : > { %1670 = vsyncadd (%p2133_p0), %s295_s11, 4294965248  ;;  %p2134_p11 = scmp.eq.s32.totalorder %s1769_s28, 0 }
  0x80   : > { %1672 = dma.done.wait (%p2134_p11), [#allocation6], 4096   ;;  %p2135_p8 = pmov %p2134_p11 }
  0x82   : > { %1674 = vsyncadd (%p2135_p8), [#allocation6], 4294963200  ;;  %p2136_p13 = pmov %p2135_p8 }
  0x83   : > { %p2137_p6 = pmov %p2135_p8 }
  0x84   : > { %1676 = dma.done.wait (%p2136_p13), [#allocation9], 2048  }
  0x85   : > { %1678 = vsyncadd (%p2137_p6), [#allocation9], 4294965248  ;;  %v359_v0 = vld [vmem:[#allocation5] sm:$0xff]  ;;  %v360_v1 = vld [vmem:[#allocation5 + $0x8] sm:$0xff]  ;;  %s2042_s12 = scalar_lea.vmem [#allocation10], %s1037_s23  ;;  %s1051_s20 = sshll.u32 %s1769_s28, 11 }
  0x86   : > { %v361_v2 = vld [vmem:[#allocation5 + $0x10] sm:$0xff]  ;;  %v1316_v3 = vpack.c.bf16 %v360_v1, %v359_v0  ;;  %v362_v4 = vld [vmem:[#allocation5 + $0x18] sm:$0xff]  ;;  %v363_v6 = vld [vmem:[#allocation5 + $0x20] sm:$0xff]  ;;  %s925_s21 = sshll.u32 %s2042_s12, 4  ;;  %s2063_s23 = scalar_lea.hbm %s2118_s7, %s1051_s20  ;;  %s2065_s21 = int_to_ptr.vmem [resolvable:$true] %s925_s21 }
  0x87   : > { %v1320_v5 = vpack.c.bf16 %v362_v4, %v361_v2  ;;  %v364_v7 = vld [vmem:[#allocation5 + $0x28] sm:$0xff]  ;;  %v343_v9 = vld [vmem:[%s1959_s8] sm:$0xff]  ;;  %v365_v10 = vld [vmem:[#allocation5 + $0x30] sm:$0xff]  ;;  %s912_s28 = scalar_lea.sflag [#allocation4], %s1953_s17  ;;  %s1623_s11 = scalar_lea.vmem %s2065_s21, 2048 }
  0x88   : > { %1317 = vmatprep.subr.bf16.mxu0 %v1316_v3  ;;  %v1324_v8 = vpack.c.bf16 %v364_v7, %v363_v6  ;;  %v366_v11 = vld [vmem:[#allocation5 + $0x38] sm:$0xff]  ;;  %1180 = vmatprep.mubr.f32.mxu0 %v343_v9  ;;  %v367_v13 = vld [vmem:[#allocation5 + $0x40] sm:$0xff]  ;;  %v368_v14 = vld [vmem:[#allocation5 + $0x48] sm:$0xff]  ;;  %p1624_p10 = scmp.ne.s32.totalorder %s2065_s21, %s1623_s11 }
  0x89   : > { %1319 = vmatpush3.bf16.msra.mxu0 %v1316_v3  ;;  %v1328_v12 = vpack.c.bf16 %v366_v11, %v365_v10  ;;  %v543_v15 = vld [vmem:[#allocation7] sm:$0xff]  ;;  %v544_v16 = vld [vmem:[#allocation7 + $0x8] sm:$0xff]  ;;  %v545_v17 = vld [vmem:[#allocation7 + $0x10] sm:$0xff]  ;;  %v1332_v21 = vpack.c.bf16 %v368_v14, %v367_v13 }
  0x8a   : > { %1321 = vmatprep.subr.bf16.mxu0 %v1320_v5  ;;  %v546_v18 = vld [vmem:[#allocation7 + $0x18] sm:$0xff]  ;;  %v1348_v19 = vpack.c.bf16 %v544_v16, %v543_v15  ;;  %v547_v22 = vld [vmem:[#allocation7 + $0x20] sm:$0xff]  ;;  %v548_v23 = vld [vmem:[#allocation7 + $0x28] sm:$0xff]  ;;  %p1625_p3 = pnand %p1624_p10, %p1902_p5 }
  0x8b   : > { %v1352_v20 = vpack.c.bf16 %v546_v18, %v545_v17  ;;  %v369_v24 = vld [vmem:[#allocation5 + $0x50] sm:$0xff]  ;;  %v370_v25 = vld [vmem:[#allocation5 + $0x58] sm:$0xff]  ;;  %v1356_v26 = vpack.c.bf16 %v548_v23, %v547_v22  ;;  %v371_v30 = vld [vmem:[#allocation5 + $0x60] sm:$0xff] }
  0x8c   : > { %1349 = vmatprep.subr.bf16.mxu1 %v1348_v19  ;;  %v1336_v27 = vpack.c.bf16 %v370_v25, %v369_v24  ;;  %v549_v28 = vld [vmem:[#allocation7 + $0x30] sm:$0xff]  ;;  %v550_v29 = vld [vmem:[#allocation7 + $0x38] sm:$0xff]  ;;  %v372_v31 = vld [vmem:[#allocation5 + $0x68] sm:$0xff]  ;;  %p1626_p7 = pneg %p1625_p3 }
  0x8d   : > { %1323 = vmatpush3.bf16.msra.mxu0 %v1320_v5  ;;  %1351 = vmatpush3.bf16.msra.mxu1 %v1348_v19  ;;  %v1360_v32 = vpack.c.bf16 %v550_v29, %v549_v28  ;;  %v1340_v33 = vpack.c.bf16 %v372_v31, %v371_v30  ;;  %v551_v34 = vld [vmem:[#allocation7 + $0x40] sm:$0xff]  ;;  %v552_v35 = vld [vmem:[#allocation7 + $0x48] sm:$0xff]  ;;  %v373_v36 = vld [vmem:[#allocation5 + $0x70] sm:$0xff] }
  0x8e   : > { %1325 = vmatprep.subr.bf16.mxu0 %v1324_v8  ;;  %1353 = vmatprep.subr.bf16.mxu1 %v1352_v20  ;;  %v374_v37 = vld [vmem:[#allocation5 + $0x78] sm:$0xff]  ;;  %v1364_v38 = vpack.c.bf16 %v552_v35, %v551_v34  ;;  %v553_v40 = vld [vmem:[#allocation7 + $0x50] sm:$0xff]  ;;  %v555_v43 = vld [vmem:[#allocation7 + $0x60] sm:$0xff] }
  0x8f   : > { %v1344_v39 = vpack.c.bf16 %v374_v37, %v373_v36  ;;  %v554_v41 = vld [vmem:[#allocation7 + $0x58] sm:$0xff]  ;;  %v556_v44 = vld [vmem:[#allocation7 + $0x68] sm:$0xff]  ;;  %v345_v47 = vld [vmem:[%s1959_s8 + $0x10] sm:$0xff] }
  0x90   : > { %v1368_v42 = vpack.c.bf16 %v554_v41, %v553_v40  ;;  %v344_v45 = vld [vmem:[%s1959_s8 + $0x8] sm:$0xff]  ;;  %v1372_v46 = vpack.c.bf16 %v556_v44, %v555_v43  ;;  %v346_v48 = vld [vmem:[%s1959_s8 + $0x18] sm:$0xff]  ;;  %v347_v49 = vld [vmem:[%s1959_s8 + $0x20] sm:$0xff] }
  0x91   : > { %1327 = vmatpush3.bf16.msra.mxu0 %v1324_v8  ;;  %1355 = vmatpush3.bf16.msra.mxu1 %v1352_v20  ;;  %v348_v50 = vld [vmem:[%s1959_s8 + $0x28] sm:$0xff]  ;;  %v349_v51 = vld [vmem:[%s1959_s8 + $0x30] sm:$0xff]  ;;  %v350_v52 = vld [vmem:[%s1959_s8 + $0x38] sm:$0xff] }
  0x92   : > { %1329 = vmatprep.subr.bf16.mxu0 %v1328_v12  ;;  %1357 = vmatprep.subr.bf16.mxu1 %v1356_v26  ;;  %v351_v53 = vld [vmem:[%s1959_s8 + $0x40] sm:$0xff]  ;;  %v352_v54 = vld [vmem:[%s1959_s8 + $0x48] sm:$0xff]  ;;  %v353_v55 = vld [vmem:[%s1959_s8 + $0x50] sm:$0xff] }
  0x93   : > { %v354_v56 = vld [vmem:[%s1959_s8 + $0x58] sm:$0xff]  ;;  %v355_v57 = vld [vmem:[%s1959_s8 + $0x60] sm:$0xff]  ;;  %v356_v58 = vld [vmem:[%s1959_s8 + $0x68] sm:$0xff] }
  0x94   : > { %v357_v59 = vld [vmem:[%s1959_s8 + $0x70] sm:$0xff]  ;;  %v358_v60 = vld [vmem:[%s1959_s8 + $0x78] sm:$0xff]  ;;  %v727_v0 = vld [vmem:[#allocation8] sm:$0xff]  ;;  %s1705_s8 = smov [#allocation10]  }
  0x95   : > { %1331 = vmatpush3.bf16.msra.mxu0 %v1328_v12  ;;  %1359 = vmatpush3.bf16.msra.mxu1 %v1356_v26  ;;  %v557_v61 = vld [vmem:[#allocation7 + $0x70] sm:$0xff]  ;;  %v558_v62 = vld [vmem:[#allocation7 + $0x78] sm:$0xff]  ;;  %v728_v1 = vld [vmem:[#allocation8 + $0x8] sm:$0xff]  ;;  %s1627_s30 = sshll.u32 %s1705_s8, 4  ;;  %s1628_s30 = int_to_ptr.vmem [resolvable:$false] %s1627_s30 }
  0x96   : > { %1333 = vmatprep.subr.bf16.mxu0 %v1332_v21  ;;  %1361 = vmatprep.subr.bf16.mxu1 %v1360_v32  ;;  %v1376_v63 = vpack.c.bf16 %v558_v62, %v557_v61  ;;  %v729_v2 = vld [vmem:[#allocation8 + $0x10] sm:$0xff]  ;;  %v1380_v3 = vpack.c.bf16 %v728_v1, %v727_v0  ;;  %v730_v4 = vld [vmem:[#allocation8 + $0x18] sm:$0xff]  ;;  %v731_v6 = vld [vmem:[#allocation8 + $0x20] sm:$0xff]  ;;  %s1629_s9 = scalar_lea.vmem %s1628_s30, 4096  ;;  %p1630_p12 = scmp.lt.s32.totalorder %s2065_s21, %s1628_s30 }
  0x97   : > { %v1384_v5 = vpack.c.bf16 %v730_v4, %v729_v2  ;;  %v732_v7 = vld [vmem:[#allocation8 + $0x28] sm:$0xff]  ;;  %v733_v9 = vld [vmem:[#allocation8 + $0x30] sm:$0xff]  ;;  %v734_v10 = vld [vmem:[#allocation8 + $0x38] sm:$0xff]  ;;  %p1631_p1 = scmp.lt.s32.totalorder %s1629_s9, %s1623_s11 }
  0x98   : > { %v1388_v8 = vpack.c.bf16 %v732_v7, %v731_v6  ;;  %v1989_v11 = vpack.c.bf16 %v734_v10, %v733_v9  ;;  %v735_v12 = vld [vmem:[#allocation8 + $0x40] sm:$0xff]  ;;  %v736_v13 = vld [vmem:[#allocation8 + $0x48] sm:$0xff]  ;;  %v737_v15 = vld [vmem:[#allocation8 + $0x50] sm:$0xff] }
  0x99   : > { %1335 = vmatpush3.bf16.msra.mxu0 %v1332_v21  ;;  %1363 = vmatpush3.bf16.msra.mxu1 %v1360_v32  ;;  %v1992_v14 = vpack.c.bf16 %v736_v13, %v735_v12  ;;  %v738_v16 = vld [vmem:[#allocation8 + $0x58] sm:$0xff]  ;;  %v739_v18 = vld [vmem:[#allocation8 + $0x60] sm:$0xff]  ;;  %v740_v19 = vld [vmem:[#allocation8 + $0x68] sm:$0xff]  ;;  %p1632_p2 = por %p1631_p1, %p1630_p12 }
  0x9a   : > { %1337 = vmatprep.subr.bf16.mxu0 %v1336_v27  ;;  %1365 = vmatprep.subr.bf16.mxu1 %v1364_v38  ;;  %v1996_v17 = vpack.c.bf16 %v738_v16, %v737_v15  ;;  %v2000_v20 = vpack.c.bf16 %v740_v19, %v739_v18  ;;  %v2008_v21 = vld [vmem:[%s2113_s2] ss:$0 sm:$0xff]  ;;  %v741_v6 = vld [vmem:[#allocation8 + $0x70] sm:$0xff]  ;;  %v742_v7 = vld [vmem:[#allocation8 + $0x78] sm:$0xff] }
  0x9b   : > { %v1043_v9 = vld [vmem:[%s2115_s4] ss:$0 sm:$0xff]  ;;  %p1633_p4 = pnand %p1632_p2, %p1626_p7 }
  0x9d   : > { %1339 = vmatpush3.bf16.msra.mxu0 %v1336_v27  ;;  %1367 = vmatpush3.bf16.msra.mxu1 %v1364_v38 }
  0x9e   : > { %1341 = vmatprep.subr.bf16.mxu0 %v1340_v33  ;;  %1369 = vmatprep.subr.bf16.mxu1 %v1368_v42 }
  0xa1   : > { %1343 = vmatpush3.bf16.msra.mxu0 %v1340_v33  ;;  %1371 = vmatpush3.bf16.msra.mxu1 %v1368_v42 }
  0xa2   : > { %1345 = vmatprep.subr.bf16.mxu0 %v1344_v39  ;;  %1373 = vmatprep.subr.bf16.mxu1 %v1372_v46 }
  0xa5   : > { %1347 = vmatpush3.bf16.msra.mxu0 %v1344_v39  ;;  %1375 = vmatpush3.bf16.msra.mxu1 %v1372_v46 }
  0xa6   : > { %1377 = vmatprep.subr.bf16.mxu1 %v1376_v63  ;;  %1381 = vmatprep.subr.bf16.mxu0 %v1380_v3 }
  0xa8   : > { %1181 = vmatmul.mubr.f32.vlgmr.msra.gmra.mrb[0].mxu0 %v344_v45 }
  0xa9   : > { %1183 = vmatprep.mubr.f32.mxu0 %v345_v47  ;;  %1379 = vmatpush3.bf16.msra.mxu1 %v1376_v63 }
  0xaa   : > { %1412 = vmatprep.subr.bf16.mxu1 %v1380_v3  ;;  %1383 = vmatpush3.bf16.msra.mxu0 %v1380_v3 }
  0xab   : > { %1385 = vmatprep.subr.bf16.mxu0 %v1384_v5 }
  0xac   : > { %1184 = vmatmul.mubr.f32.gmra.mrb[2].mxu0 %v346_v48 }
  0xad   : > { %1186 = vmatprep.mubr.f32.mxu0 %v347_v49 }
  0xae   : > { %1387 = vmatpush3.bf16.msra.mxu0 %v1384_v5 }
  0xaf   : > { %1389 = vmatprep.subr.bf16.mxu0 %v1388_v8 }
  0xb0   : > { %1187 = vmatmul.mubr.f32.gmra.mrb[4].mxu0 %v348_v50 }
  0xb1   : > { %1189 = vmatprep.mubr.f32.mxu0 %v349_v51 }
  0xb2   : > { %1391 = vmatpush3.bf16.msra.mxu0 %v1388_v8 }
  0xb3   : > { %1393 = vmatprep.subr.bf16.mxu0 %v1989_v11 }
  0xb4   : > { %1190 = vmatmul.mubr.f32.gmra.mrb[6].mxu0 %v350_v52 }
  0xb5   : > { %1192 = vmatprep.mubr.f32.mxu0 %v351_v53 }
  0xb6   : > { %1395 = vmatpush3.bf16.msra.mxu0 %v1989_v11 }
  0xb7   : > { %1397 = vmatprep.subr.bf16.mxu0 %v1992_v14 }
  0xb8   : > { %1193 = vmatmul.mubr.f32.gmra.mrb[8].mxu0 %v352_v54 }
  0xb9   : > { %1195 = vmatprep.mubr.f32.mxu0 %v353_v55 }
  0xba   : > { %1399 = vmatpush3.bf16.msra.mxu0 %v1992_v14 }
  0xbb   : > { %1401 = vmatprep.subr.bf16.mxu0 %v1996_v17 }
  0xbc   : > { %1196 = vmatmul.mubr.f32.gmra.mrb[10].mxu0 %v354_v56 }
  0xbd   : > { %1198 = vmatprep.mubr.f32.mxu0 %v355_v57 }
  0xbe   : > { %1403 = vmatpush3.bf16.msra.mxu0 %v1996_v17 }
  0xbf   : > { %1405 = vmatprep.subr.bf16.mxu0 %v2000_v20 }
  0xc0   : > { %1199 = vmatmul.mubr.f32.gmra.mrb[12].mxu0 %v356_v58 }
  0xc1   : > { %1201 = vmatprep.mubr.f32.mxu0 %v357_v59 }
  0xc2   : > { %1407 = vmatpush3.bf16.msra.mxu0 %v2000_v20 }
  0xc4   : > { %1202 = vmatmul.mubr.f32.gmra.mrb[14].mxu0 %v358_v60 }
 0x17b   : > { %v1182_v22 = vpop.f32.mrb[0].mxu0 }
 0x17c   : > { %v454_v23 = vadd.f32 %v1182_v22, %v2008_v21  ;;  %v448_v24 = vpop.f32.mrb[1].mxu0 }
 0x17d   : > { %v449_v25 = vadd.f32 %v2008_v21, %v448_v24 }
 0x17e   : > { %v528_v28 = vmax.f32 %v454_v23, 0.0 }
 0x17f   : > { %v1185_v26 = vpop.f32.mrb[2].mxu0  ;;  %v527_v27 = vmax.f32 %v449_v25, 0.0 }
 0x180   : > { %v464_v29 = vadd.f32 %v1185_v26, %v2008_v21  ;;  %v458_v30 = vpop.f32.mrb[3].mxu0 }
 0x181   : > { %v459_v31 = vadd.f32 %v2008_v21, %v458_v30  ;;  %1236 = vmatprep.mubr.f32.mxu1 %v527_v27 }
 0x182   : > { %1237 = vmatmul.mubr.f32.vlgmr.msra.gmra.mrb[0].mxu1 %v528_v28  ;;  %v530_v34 = vmax.f32 %v464_v29, 0.0 }
 0x183   : > { %v529_v32 = vmax.f32 %v459_v31, 0.0  ;;  %v1188_v33 = vpop.f32.mrb[4].mxu0  ;;  %1420 = vmatpush3.bf16.msra.mxu1 %v1380_v3 }
 0x184   : > { %v474_v35 = vadd.f32 %v1188_v33, %v2008_v21  ;;  %v468_v36 = vpop.f32.mrb[5].mxu0  ;;  %1413 = vmatprep.subr.bf16.mxu1 %v1384_v5 }
 0x185   : > { %v469_v37 = vadd.f32 %v2008_v21, %v468_v36  ;;  %1239 = vmatprep.mubr.f32.mxu1 %v529_v32 }
 0x186   : > { %1240 = vmatmul.mubr.f32.gmra.mrb[2].mxu1 %v530_v34  ;;  %v532_v40 = vmax.f32 %v474_v35, 0.0 }
 0x187   : > { %v531_v38 = vmax.f32 %v469_v37, 0.0  ;;  %v1191_v39 = vpop.f32.mrb[6].mxu0  ;;  %1421 = vmatpush3.bf16.msra.mxu1 %v1384_v5 }
 0x188   : > { %v484_v41 = vadd.f32 %v1191_v39, %v2008_v21  ;;  %v478_v42 = vpop.f32.mrb[7].mxu0  ;;  %1414 = vmatprep.subr.bf16.mxu1 %v1388_v8 }
 0x189   : > { %v479_v43 = vadd.f32 %v2008_v21, %v478_v42  ;;  %1242 = vmatprep.mubr.f32.mxu1 %v531_v38 }
 0x18a   : > { %1243 = vmatmul.mubr.f32.gmra.mrb[4].mxu1 %v532_v40  ;;  %v534_v46 = vmax.f32 %v484_v41, 0.0 }
 0x18b   : > { %v533_v44 = vmax.f32 %v479_v43, 0.0  ;;  %v1194_v45 = vpop.f32.mrb[8].mxu0  ;;  %1422 = vmatpush3.bf16.msra.mxu1 %v1388_v8  ;;  %v1408_v8 = vpack.c.bf16 %v742_v7, %v741_v6 }
 0x18c   : > { %v494_v47 = vadd.f32 %v1194_v45, %v2008_v21  ;;  %v488_v48 = vpop.f32.mrb[9].mxu0  ;;  %1415 = vmatprep.subr.bf16.mxu1 %v1989_v11 }
 0x18d   : > { %v489_v49 = vadd.f32 %v2008_v21, %v488_v48  ;;  %1245 = vmatprep.mubr.f32.mxu1 %v533_v44  ;;  %1409 = vmatprep.subr.bf16.mxu0 %v1408_v8 }
 0x18e   : > { %1246 = vmatmul.mubr.f32.gmra.mrb[6].mxu1 %v534_v46  ;;  %v536_v52 = vmax.f32 %v494_v47, 0.0  ;;  %1411 = vmatpush3.bf16.msra.mxu0 %v1408_v8 }
 0x18f   : > { %v535_v50 = vmax.f32 %v489_v49, 0.0  ;;  %v1197_v51 = vpop.f32.mrb[10].mxu0  ;;  %1423 = vmatpush3.bf16.msra.mxu1 %v1989_v11 }
 0x190   : > { %v504_v53 = vadd.f32 %v1197_v51, %v2008_v21  ;;  %v498_v54 = vpop.f32.mrb[11].mxu0  ;;  %1416 = vmatprep.subr.bf16.mxu1 %v1992_v14 }
 0x191   : > { %v499_v55 = vadd.f32 %v2008_v21, %v498_v54  ;;  %1248 = vmatprep.mubr.f32.mxu1 %v535_v50 }
 0x192   : > { %1249 = vmatmul.mubr.f32.gmra.mrb[8].mxu1 %v536_v52  ;;  %v538_v58 = vmax.f32 %v504_v53, 0.0 }
 0x193   : > { %v537_v56 = vmax.f32 %v499_v55, 0.0  ;;  %v1200_v57 = vpop.f32.mrb[12].mxu0  ;;  %1424 = vmatpush3.bf16.msra.mxu1 %v1992_v14 }
 0x194   : > { %v514_v59 = vadd.f32 %v1200_v57, %v2008_v21  ;;  %v508_v60 = vpop.f32.mrb[13].mxu0  ;;  %1417 = vmatprep.subr.bf16.mxu1 %v1996_v17 }
 0x195   : > { %v509_v61 = vadd.f32 %v2008_v21, %v508_v60  ;;  %1251 = vmatprep.mubr.f32.mxu1 %v537_v56 }
 0x196   : > { %1252 = vmatmul.mubr.f32.gmra.mrb[10].mxu1 %v538_v58  ;;  %v540_v0 = vmax.f32 %v514_v59, 0.0  ;;  %v1044_v58 = vld [vmem:[%s2117_s6] ss:$0 sm:$0xff] }
 0x197   : > { %v539_v62 = vmax.f32 %v509_v61, 0.0  ;;  %v1203_v63 = vpop.f32.mrb[14].mxu0  ;;  %1425 = vmatpush3.bf16.msra.mxu1 %v1996_v17 }
 0x198   : > { %v524_v1 = vadd.f32 %v1203_v63, %v2008_v21  ;;  %v518_v2 = vpop.f32.mrb[15].mxu0  ;;  %1418 = vmatprep.subr.bf16.mxu1 %v2000_v20 }
 0x199   : > { %v519_v3 = vadd.f32 %v2008_v21, %v518_v2  ;;  %1254 = vmatprep.mubr.f32.mxu1 %v539_v62 }
 0x19a   : > { %1255 = vmatmul.mubr.f32.gmra.mrb[12].mxu1 %v540_v0  ;;  %v542_v5 = vmax.f32 %v524_v1, 0.0 }
 0x19b   : > { %v541_v4 = vmax.f32 %v519_v3, 0.0  ;;  %1426 = vmatpush3.bf16.msra.mxu1 %v2000_v20 }
 0x19c   : > { %1419 = vmatprep.subr.bf16.mxu1 %v1408_v8 }
 0x19d   : > { %1257 = vmatprep.mubr.f32.mxu1 %v541_v4 }
 0x19e   : > { %1258 = vmatmul.mubr.f32.gmra.mrb[14].mxu1 %v542_v5 }
 0x19f   : > { %1427 = vmatpush3.bf16.msra.mxu1 %v1408_v8 }
 0x255   : > { %v1238_v10 = vpop.f32.mrb[0].mxu1 }
 0x256   : > { %v638_v11 = vadd.f32 %v1238_v10, %v1043_v9  ;;  %v632_v12 = vpop.f32.mrb[1].mxu1 }
 0x257   : > { %v633_v13 = vadd.f32 %v1043_v9, %v632_v12 }
 0x258   : > { %v712_v16 = vmax.f32 %v638_v11, 0.0 }
 0x259   : > { %v711_v14 = vmax.f32 %v633_v13, 0.0  ;;  %v1241_v15 = vpop.f32.mrb[2].mxu1 }
 0x25a   : > { %v648_v17 = vadd.f32 %v1241_v15, %v1043_v9  ;;  %v642_v18 = vpop.f32.mrb[3].mxu1 }
 0x25b   : > { %v643_v19 = vadd.f32 %v1043_v9, %v642_v18  ;;  %1292 = vmatprep.mubr.f32.mxu0 %v711_v14 }
 0x25c   : > { %1293 = vmatmul.mubr.f32.vlgmr.msra.gmra.mrb[16].mxu0 %v712_v16  ;;  %v714_v22 = vmax.f32 %v648_v17, 0.0 }
 0x25d   : > { %v713_v20 = vmax.f32 %v643_v19, 0.0  ;;  %v1244_v21 = vpop.f32.mrb[4].mxu1 }
 0x25e   : > { %v658_v23 = vadd.f32 %v1244_v21, %v1043_v9  ;;  %v652_v24 = vpop.f32.mrb[5].mxu1 }
 0x25f   : > { %v653_v25 = vadd.f32 %v1043_v9, %v652_v24  ;;  %1295 = vmatprep.mubr.f32.mxu0 %v713_v20 }
 0x260   : > { %1296 = vmatmul.mubr.f32.gmra.mrb[18].mxu0 %v714_v22  ;;  %v716_v28 = vmax.f32 %v658_v23, 0.0 }
 0x261   : > { %v715_v26 = vmax.f32 %v653_v25, 0.0  ;;  %v1247_v27 = vpop.f32.mrb[6].mxu1 }
 0x262   : > { %v668_v29 = vadd.f32 %v1247_v27, %v1043_v9  ;;  %v662_v30 = vpop.f32.mrb[7].mxu1 }
 0x263   : > { %v663_v31 = vadd.f32 %v1043_v9, %v662_v30  ;;  %1298 = vmatprep.mubr.f32.mxu0 %v715_v26 }
 0x264   : > { %1299 = vmatmul.mubr.f32.gmra.mrb[20].mxu0 %v716_v28  ;;  %v718_v34 = vmax.f32 %v668_v29, 0.0 }
 0x265   : > { %v717_v32 = vmax.f32 %v663_v31, 0.0  ;;  %v1250_v33 = vpop.f32.mrb[8].mxu1 }
 0x266   : > { %v678_v35 = vadd.f32 %v1250_v33, %v1043_v9  ;;  %v672_v36 = vpop.f32.mrb[9].mxu1 }
 0x267   : > { %v673_v37 = vadd.f32 %v1043_v9, %v672_v36  ;;  %1301 = vmatprep.mubr.f32.mxu0 %v717_v32 }
 0x268   : > { %1302 = vmatmul.mubr.f32.gmra.mrb[22].mxu0 %v718_v34  ;;  %v720_v40 = vmax.f32 %v678_v35, 0.0 }
 0x269   : > { %v719_v38 = vmax.f32 %v673_v37, 0.0  ;;  %v1253_v39 = vpop.f32.mrb[10].mxu1 }
 0x26a   : > { %v688_v41 = vadd.f32 %v1253_v39, %v1043_v9  ;;  %v682_v42 = vpop.f32.mrb[11].mxu1 }
 0x26b   : > { %v683_v43 = vadd.f32 %v1043_v9, %v682_v42  ;;  %1304 = vmatprep.mubr.f32.mxu1 %v719_v38 }
 0x26c   : > { %1305 = vmatmul.mubr.f32.vlgmr.msra.gmra.mrb[16].mxu1 %v720_v40  ;;  %v722_v46 = vmax.f32 %v688_v41, 0.0 }
 0x26d   : > { %v721_v44 = vmax.f32 %v683_v43, 0.0  ;;  %v1256_v45 = vpop.f32.mrb[12].mxu1 }
 0x26e   : > { %v698_v47 = vadd.f32 %v1256_v45, %v1043_v9  ;;  %v692_v48 = vpop.f32.mrb[13].mxu1 }
 0x26f   : > { %v693_v49 = vadd.f32 %v1043_v9, %v692_v48  ;;  %1307 = vmatprep.mubr.f32.mxu1 %v721_v44 }
 0x270   : > { %1308 = vmatmul.mubr.f32.gmra.mrb[18].mxu1 %v722_v46  ;;  %v724_v52 = vmax.f32 %v698_v47, 0.0 }
 0x271   : > { %v723_v50 = vmax.f32 %v693_v49, 0.0  ;;  %v1259_v51 = vpop.f32.mrb[14].mxu1 }
 0x272   : > { %v708_v53 = vadd.f32 %v1259_v51, %v1043_v9  ;;  %v702_v54 = vpop.f32.mrb[15].mxu1 }
 0x273   : > { %v703_v55 = vadd.f32 %v1043_v9, %v702_v54  ;;  %1310 = vmatprep.mubr.f32.mxu1 %v723_v50 }
 0x274   : > { %1311 = vmatmul.mubr.f32.gmra.mrb[20].mxu1 %v724_v52  ;;  %v726_v57 = vmax.f32 %v708_v53, 0.0 }
 0x275   : > { %v725_v56 = vmax.f32 %v703_v55, 0.0 }
 0x277   : > { %1313 = vmatprep.mubr.f32.mxu1 %v725_v56 }
 0x278   : > { %1314 = vmatmul.mubr.f32.gmra.mrb[22].mxu1 %v726_v57 }
 0x32f   : > { %v1294_v59 = vpop.f32.mrb[16].mxu0 }
 0x330   : > { %v822_v60 = vadd.f32 %v1294_v59, %v1044_v58  ;;  %v816_v61 = vpop.f32.mrb[17].mxu0 }
 0x331   : > { %v817_v62 = vadd.f32 %v1044_v58, %v816_v61 }
 0x332   : > { %896 = vst [vmem:[%s2042_s12 + $0x8] sm:$0xff] %v822_v60 }
 0x333   : > { %895 = vst [vmem:[%s2042_s12] sm:$0xff] %v817_v62  ;;  %v1297_v63 = vpop.f32.mrb[18].mxu0 }
 0x334   : > { %v832_v0 = vadd.f32 %v1297_v63, %v1044_v58  ;;  %v826_v1 = vpop.f32.mrb[19].mxu0 }
 0x335   : > { %v827_v2 = vadd.f32 %v1044_v58, %v826_v1 }
 0x336   : > { %898 = vst [vmem:[%s2042_s12 + $0x18] sm:$0xff] %v832_v0 }
 0x337   : > { %897 = vst [vmem:[%s2042_s12 + $0x10] sm:$0xff] %v827_v2  ;;  %v1300_v3 = vpop.f32.mrb[20].mxu0 }
 0x338   : > { %v842_v4 = vadd.f32 %v1300_v3, %v1044_v58  ;;  %v836_v5 = vpop.f32.mrb[21].mxu0 }
 0x339   : > { %v837_v6 = vadd.f32 %v1044_v58, %v836_v5 }
 0x33a   : > { %900 = vst [vmem:[%s2042_s12 + $0x28] sm:$0xff] %v842_v4 }
 0x33b   : > { %899 = vst [vmem:[%s2042_s12 + $0x20] sm:$0xff] %v837_v6  ;;  %v1303_v7 = vpop.f32.mrb[22].mxu0 }
 0x33c   : > { %v852_v8 = vadd.f32 %v1303_v7, %v1044_v58  ;;  %v846_v9 = vpop.f32.mrb[23].mxu0 }
 0x33d   : > { %v847_v10 = vadd.f32 %v1044_v58, %v846_v9 }
 0x33e   : > { %902 = vst [vmem:[%s2042_s12 + $0x38] sm:$0xff] %v852_v8 }
 0x33f   : > { %901 = vst [vmem:[%s2042_s12 + $0x30] sm:$0xff] %v847_v10  ;;  %v1306_v11 = vpop.f32.mrb[16].mxu1 }
 0x340   : > { %v862_v12 = vadd.f32 %v1306_v11, %v1044_v58  ;;  %v856_v13 = vpop.f32.mrb[17].mxu1 }
 0x341   : > { %v857_v14 = vadd.f32 %v1044_v58, %v856_v13 }
 0x342   : > { %904 = vst [vmem:[%s2042_s12 + $0x48] sm:$0xff] %v862_v12 }
 0x343   : > { %903 = vst [vmem:[%s2042_s12 + $0x40] sm:$0xff] %v857_v14  ;;  %v1309_v15 = vpop.f32.mrb[18].mxu1 }
 0x344   : > { %v872_v16 = vadd.f32 %v1309_v15, %v1044_v58  ;;  %v866_v17 = vpop.f32.mrb[19].mxu1 }
 0x345   : > { %v867_v18 = vadd.f32 %v1044_v58, %v866_v17 }
 0x346   : > { %906 = vst [vmem:[%s2042_s12 + $0x58] sm:$0xff] %v872_v16 }
 0x347   : > { %905 = vst [vmem:[%s2042_s12 + $0x50] sm:$0xff] %v867_v18  ;;  %v1312_v19 = vpop.f32.mrb[20].mxu1 }
 0x348   : > { %v882_v20 = vadd.f32 %v1312_v19, %v1044_v58  ;;  %v876_v21 = vpop.f32.mrb[21].mxu1 }
 0x349   : > { %v877_v22 = vadd.f32 %v1044_v58, %v876_v21 }
 0x34a   : > { %908 = vst [vmem:[%s2042_s12 + $0x68] sm:$0xff] %v882_v20 }
 0x34b   : > { %907 = vst [vmem:[%s2042_s12 + $0x60] sm:$0xff] %v877_v22  ;;  %v1315_v23 = vpop.f32.mrb[22].mxu1 }
 0x34c   : > { %v892_v24 = vadd.f32 %v1315_v23, %v1044_v58  ;;  %v886_v25 = vpop.f32.mrb[23].mxu1 }
 0x34d   : > { %v887_v26 = vadd.f32 %v1044_v58, %v886_v25 }
 0x34e   : > { %910 = vst [vmem:[%s2042_s12 + $0x78] sm:$0xff] %v892_v24 }
 0x34f   : > { %909 = vst [vmem:[%s2042_s12 + $0x70] sm:$0xff] %v887_v26 }
 0x350   : > { %1636 = shalt.err (!%p1633_p4)
}
 0x351   : > { %s1637_s13 = scalar_lea.hbm %s2063_s23, 2048  ;;  %s1641_s14 = scalar_lea.hbm %s2118_s7, 4096 }
 0x352   : > { %p1638_p9 = scmp.ne.s32.totalorder %s2063_s23, %s1637_s13  ;;  %p1642_p8 = scmp.lt.u32.totalorder %s2063_s23, %s2118_s7 }
 0x353   : > { %p1643_p13 = scmp.lt.u32.totalorder %s1641_s14, %s1637_s13  ;;  %p1645_p10 = scmp.lt.u32.totalorder %s1637_s13, %s2063_s23 }
 0x354   : > { %p1639_p0 = pnand %p1638_p9, %p1902_p5 }
 0x355   : > { %p1644_p6 = por %p1643_p13, %p1642_p8 }
 0x356   : > { %p1640_p11 = pneg %p1639_p0 }
 0x357   : > { %p1646_p3 = por %p1645_p10, %p1644_p6 }
 0x359   : > { %p1647_p7 = pnand %p1646_p3, %p1640_p11 }
 0x35b   : > { %1650 = shalt.err (!%p1647_p7)
}
 0x35c   : > { %s1706_s16 = smov 128   ;;  %s1707_s29 = smov 8  }
 0x35d   : > { %1442 = dma.vmem_to_hbm [thread:$0]  (%p1902_p5), %s2065_s21, 2048, %s2063_s23, %s912_s28, %s1706_s16, %s1706_s16, %s1707_s29  }
 0x35e PF: > { %s2138_s11 = sld [smem:[#allocation15_spill]]  ;;  %s940_s8 = sand.u32 1, %s1685_s24  }
 0x35f   : > { %p2140_p1 = scmp.ge.s32.totalorder %s1697_s27, 2  ;;  %s941_s30 = scalar_lea.sflag [#allocation4], %s940_s8 }
 0x364   : > { %p2139_p12 = scmp.ne.s32.totalorder %s2138_s11, 0 }
 0x366   : > { %p1459_p2 = pnand %p2140_p1, %p2139_p12 }
 0x368   : > { %1680 = dma.done.wait (!%p1459_p2), %s941_s30, 2048  }
 0x369   : > { %1682 = vsyncadd (!%p1459_p2), %s941_s30, 4294965248  ;;  %p22_p4 = scmp.ge.s32.totalorder %s1888_s22, 4   ;;  %s2141_s24 = smov %s1689_s25 }
 0x36a   : > { %s2142_s25 = smov %s1693_s26  ;;  %s2143_s26 = smov %s1898_s18 }
 0x36b   : > { %s2144_s27 = smov %s1888_s22  ;;  %24 = sbr.rel (!%p22_p4) target bundleno = 7 (0x7), region = 105 }
 0x372   :  { %946 = vsyncpa [#allocation3], 1 }
 0x373   :  { %948 = vsyncpa [#allocation3 + $0x1], 1 }
 0x374   :  { %949 = vsyncpa [#allocation6], 1 }
 0x375   :  { %950 = vsyncpa [#allocation9], 1 }
 0x376   :  { %951 = vsyncpa [#allocation4], 1 }
 0x377   :  { %953 = vsyncpa [#allocation4 + $0x1], 1 }

// kernel: tpu_custom_call.1
= control target key start
LH: loop header
LB: loop body
LE: loop exit
PB: predicated region body
PF: predicated region fallthrough
CT: control target
= control target key end

     0   :  { %12 = vsyncpa [#allocation3], 0  ;;  %s2111_s0 = inlined_call_operand.hbm [shape: f32[256,128], index: 0, kind: input, shape index: {}]   ;;  %s2112_s1 = inlined_call_operand.hbm [shape: f32[128,128], index: 1, kind: input, shape index: {}]   ;;  %s2113_s2 = inlined_call_operand.vmem [shape: f32[1,128], index: 2, kind: input, shape index: {}]   ;;  %s2114_s3 = inlined_call_operand.hbm [shape: f32[128,128], index: 3, kind: input, shape index: {}]   ;;  %s2115_s4 = inlined_call_operand.vmem [shape: f32[1,128], index: 4, kind: input, shape index: {}]   ;;  %s2116_s5 = inlined_call_operand.hbm [shape: f32[128,128], index: 5, kind: input, shape index: {}]   ;;  %s2117_s6 = inlined_call_operand.vmem [shape: f32[1,128], index: 6, kind: input, shape index: {}]   ;;  %s2118_s7 = inlined_call_operand.hbm [shape: f32[256,128], index: 7, kind: output, shape index: {}]  }
   0x1   :  { %14 = vsyncpa [#allocation3 + $0x1], 0 }
   0x2   :  { %15 = vsyncpa [#allocation6], 0 }
   0x3   :  { %16 = vsyncpa [#allocation9], 0 }
   0x4   :  { %17 = vsyncpa [#allocation4], 0 }
   0x5   :  { %19 = vsyncpa [#allocation4 + $0x1], 0  ;;  %s1748_s24 = smov 0   ;;  %s1750_s25 = smov 0  }
   0x6   :  { %s1752_s26 = smov 0   ;;  %s1754_s27 = smov 0  }
   0x7 LB: > { %s1769_s28 = sadd.s32 4294967295, %s1697_s27   ;;  %s1027_s29 = sadd.s32 4294967294, %s1697_s27   ;;  %s1697_s27 = sphi %s1754_s27, %s2144_s27   ;;  %s1693_s26 = sphi %s1752_s26, %s2143_s26   ;;  %s1689_s25 = sphi %s1750_s25, %s2142_s25   ;;  %s1685_s24 = sphi %s1748_s24, %s2141_s24  }
   0x8   : > { %p45_p0 = scmp.ne.s32.totalorder %s1689_s25, %s1685_s24  ;;  %p2119_p1 = scmp.eq.s32.totalorder %s1769_s28, 0 }
   0x9   : > { %p201_p3 = scmp.eq.s32.totalorder %s1027_s29, 1  ;;  %p1028_p5 = scmp.ge.s32.totalorder %s1697_s27, 1 }
   0xa   : > { %p1778_p4 = por %p2119_p1, %p45_p0  ;;  %p208_p7 = scmp.lt.s32.totalorder %s1697_s27, 3 }
   0xb   : > { %p1783_p6 = por %p201_p3, %p45_p0  ;;  %s1699_s10 = smov [#allocation5]  }
   0xc   : > { %s2123_s30 = scalar_select %p1778_p4, 1, 0 }
   0xd   : > { %s2124_s8 = scalar_select %p1783_p6, 1, 0 }
   0xe   : > { %p1788_p8 = pnand %p1028_p5, %p208_p7  ;;  %s220_s11 = sshll.u32 %s1699_s10, 4  ;;  %s1792_s11 = int_to_ptr.vmem [resolvable:$true] %s220_s11 }
   0xf   : > { %2125 = sst [smem:[#allocation15_spill]] %s2124_s8  ;;  %s1700_s13 = smov [#allocation7]  }
  0x10   : > { %s2126_s9 = scalar_select %p1788_p8, 1, 0 }
  0x11   : > { %p1444_p9 = pneg %p1788_p8  ;;  %s236_s14 = sshll.u32 %s1700_s13, 4  ;;  %s1803_s14 = int_to_ptr.vmem [resolvable:$true] %s236_s14 }
  0x12   : > { %s1701_s15 = smov [#allocation8]   ;;  %s1509_s19 = scalar_lea.hbm %s2112_s1, 2048 }
  0x13   : > { %p1799_p11 = pnand %p1444_p9, %p2119_p1  ;;  %s1805_s16 = sshll.u32 %s1701_s15, 4  ;;  %s253_s16 = int_to_ptr.vmem [resolvable:$true] %s1805_s16 }
  0x14   : > { %p1510_p12 = scmp.ne.s32.totalorder %s2112_s1, %s1509_s19  ;;  %p1516_p5 = scmp.lt.u32.totalorder %s1509_s19, %s2112_s1 }
  0x15   : > { %p1815_p13 = pneg %p1799_p11 }
  0x17   : > { %p1512_p0 = pnand %p1815_p13, %p1510_p12 }
  0x19   : > { %p1513_p3 = pneg %p1512_p0 }
  0x1b   : > { %p1518_p7 = pnand %p1516_p5, %p1513_p3 }
  0x1d   : > { %1521 = shalt.err (!%p1518_p7)
}
  0x1e   : > { %s1522_s10 = scalar_lea.vmem %s1792_s11, 2048  ;;  %p1530_p2 = scmp.lt.s32.totalorder %s1792_s11, %s1792_s11 }
  0x1f   : > { %p1523_p9 = scmp.ne.s32.totalorder %s1792_s11, %s1522_s10  ;;  %p1531_p6 = scmp.lt.s32.totalorder %s1522_s10, %s1522_s10 }
  0x21   : > { %p1525_p10 = pnand %p1523_p9, %p1815_p13  ;;  %p1532_p12 = por %p1531_p6, %p1530_p2 }
  0x23   : > { %p1526_p1 = pneg %p1525_p10 }
  0x25   : > { %p1533_p0 = pnand %p1532_p12, %p1526_p1 }
  0x27   : > { %1536 = shalt.err (!%p1533_p0)
}
  0x28   : > { %s1702_s13 = smov 128   ;;  %s1703_s15 = smov 8  }
  0x29   : > { %1447 = dma.hbm_to_vmem [thread:$0]  (!%p1799_p11), %s2112_s1, 2048, %s1792_s11, [#allocation6], %s1702_s13, %s1702_s13, %s1703_s15  }
  0x2a   : > { %s1537_s21 = scalar_lea.hbm %s2114_s3, 2048 }
  0x2b   : > { %p1538_p1 = scmp.ne.s32.totalorder %s2114_s3, %s1537_s21  ;;  %p1544_p10 = scmp.lt.u32.totalorder %s1537_s21, %s2114_s3 }
  0x2d   : > { %p1540_p2 = pnand %p1538_p1, %p1815_p13 }
  0x2f   : > { %p1541_p6 = pneg %p1540_p2 }
  0x31   : > { %p1546_p3 = pnand %p1544_p10, %p1541_p6 }
  0x33   : > { %1549 = shalt.err (!%p1546_p3)
}
  0x34   : > { %s1550_s11 = scalar_lea.vmem %s1803_s14, 2048  ;;  %p1558_p12 = scmp.lt.s32.totalorder %s1803_s14, %s1803_s14 }
  0x35   : > { %p1551_p5 = scmp.ne.s32.totalorder %s1803_s14, %s1550_s11  ;;  %p1559_p0 = scmp.lt.s32.totalorder %s1550_s11, %s1550_s11 }
  0x37   : > { %p1553_p7 = pnand %p1551_p5, %p1815_p13  ;;  %p1560_p1 = por %p1559_p0, %p1558_p12 }
  0x39   : > { %p1554_p9 = pneg %p1553_p7 }
  0x3b   : > { %p1561_p2 = pnand %p1560_p1, %p1554_p9 }
  0x3d   : > { %1564 = shalt.err (!%p1561_p2)
}
  0x3e   : > { %1450 = dma.hbm_to_vmem [thread:$0]  (!%p1799_p11), %s2114_s3, 2048, %s1803_s14, [#allocation6], %s1702_s13, %s1702_s13, %s1703_s15  }
  0x3f   : > { %s1565_s20 = scalar_lea.hbm %s2116_s5, 2048 }
  0x40   : > { %p1566_p6 = scmp.ne.s32.totalorder %s2116_s5, %s1565_s20  ;;  %p1572_p5 = scmp.lt.u32.totalorder %s1565_s20, %s2116_s5 }
  0x42   : > { %p1568_p10 = pnand %p1566_p6, %p1815_p13 }
  0x44   : > { %p1569_p3 = pneg %p1568_p10 }
  0x46   : > { %p1574_p7 = pnand %p1572_p5, %p1569_p3 }
  0x48   : > { %1577 = shalt.err (!%p1574_p7)
}
  0x49   : > { %s1578_s11 = scalar_lea.vmem %s253_s16, 2048  ;;  %p1586_p1 = scmp.lt.s32.totalorder %s253_s16, %s253_s16 }
  0x4a   : > { %p1579_p9 = scmp.ne.s32.totalorder %s253_s16, %s1578_s11  ;;  %p1587_p2 = scmp.lt.s32.totalorder %s1578_s11, %s1578_s11 }
  0x4c   : > { %p1581_p12 = pnand %p1579_p9, %p1815_p13  ;;  %p1588_p4 = por %p1587_p2, %p1586_p1 }
  0x4e   : > { %p1582_p0 = pneg %p1581_p12 }
  0x50   : > { %p1589_p8 = pnand %p1588_p4, %p1582_p0 }
  0x52   : > { %1592 = shalt.err (!%p1589_p8)
}
  0x53   : > { %1453 = dma.hbm_to_vmem [thread:$0]  (!%p1799_p11), %s2116_s5, 2048, %s253_s16, [#allocation9], %s1702_s13, %s1702_s13, %s1703_s15  }
  0x54   : > { %s1888_s22 = sadd.s32 1, %s1697_s27   ;;  %s32_s17 = sadd.s32 1, %s1693_s26 }
  0x55   : > { %s29_s12 = ssub.s32 %s1697_s27, %s1888_s22  ;;  %p39_p8 = scmp.ne.s32.totalorder %s1693_s26, %s1689_s25 }
  0x56   : > { %p30_p4 = scmp.eq.s32.totalorder %s29_s12, 0  ;;  %p40_p13 = scmp.eq.s32.totalorder %s1697_s27, 0 }
  0x57   : > { %p1465_p6 = scmp.lt.s32.totalorder %s1697_s27, 2  ;;  %p2129_p3 = scmp.eq.s32.totalorder %s1769_s28, 1 }
  0x58   : > { %s1898_s18 = scalar_select %p30_p4, %s1693_s26, %s32_s17  }
  0x59   : > { %p41_p10 = por %p40_p13, %p39_p8  ;;  %p1902_p5 = por %p2129_p3, %p39_p8 }
  0x5a   : > { %s269_s20 = sand.u32 1, %s1693_s26   ;;  %s1050_s21 = sshll.u32 %s1697_s27, 11 }
  0x5b   : > { %s1033_s16 = sshll.u32 %s269_s20, 7  ;;  %s1911_s10 = scalar_lea.hbm %s2111_s0, %s1050_s21 }
  0x5c   : > { %s273_s11 = scalar_lea.vmem [#allocation2], %s1033_s16  ;;  %p1913_p11 = pnand %p1465_p6, %p41_p10 }
  0x5d   : > { %s280_s14 = sshll.u32 %s273_s11, 4  ;;  %s1919_s12 = scalar_lea.sflag [#allocation3], %s269_s20  ;;  %s1917_s14 = int_to_ptr.vmem [resolvable:$true] %s280_s14 }
  0x5e   : > { %s1593_s17 = scalar_lea.hbm %s1911_s10, 2048  ;;  %p1595_p9 = pneg %p1913_p11 }
  0x5f   : > { %p1594_p7 = scmp.ne.s32.totalorder %s1911_s10, %s1593_s17  ;;  %s1598_s23 = scalar_lea.hbm %s2111_s0, 4096 }
  0x60   : > { %p1599_p1 = scmp.lt.u32.totalorder %s1911_s10, %s2111_s0  ;;  %p1600_p2 = scmp.lt.u32.totalorder %s1598_s23, %s1593_s17 }
  0x61   : > { %p1596_p12 = pnand %p1595_p9, %p1594_p7  ;;  %p1602_p8 = scmp.lt.u32.totalorder %s1593_s17, %s1911_s10 }
  0x62   : > { %p1601_p4 = por %p1600_p2, %p1599_p1 }
  0x63   : > { %p1597_p0 = pneg %p1596_p12 }
  0x64   : > { %p1603_p13 = por %p1602_p8, %p1601_p4 }
  0x66   : > { %p1604_p6 = pnand %p1603_p13, %p1597_p0 }
  0x68   : > { %1607 = shalt.err (!%p1604_p6)
}
  0x69   : > { %s1608_s20 = scalar_lea.vmem %s1917_s14, 2048  ;;  %s1704_s21 = smov [#allocation2]  }
  0x6a   : > { %p1609_p10 = scmp.ne.s32.totalorder %s1917_s14, %s1608_s20  ;;  %s1613_s16 = sshll.u32 %s1704_s21, 4  ;;  %s1614_s16 = int_to_ptr.vmem [resolvable:$false] %s1613_s16 }
  0x6b   : > { %s1615_s29 = scalar_lea.vmem %s1614_s16, 4096  ;;  %p1616_p12 = scmp.lt.s32.totalorder %s1917_s14, %s1614_s16 }
  0x6c   : > { %p1611_p3 = pnand %p1609_p10, %p1595_p9  ;;  %p1617_p1 = scmp.lt.s32.totalorder %s1615_s29, %s1608_s20 }
  0x6e   : > { %p1612_p7 = pneg %p1611_p3  ;;  %p1618_p2 = por %p1617_p1, %p1616_p12 }
  0x70   : > { %p1619_p4 = pnand %p1618_p2, %p1612_p7 }
  0x72   : > { %1622 = shalt.err (!%p1619_p4)
}
  0x73   : > { %1457 = dma.hbm_to_vmem [thread:$0]  (!%p1913_p11), %s1911_s10, 2048, %s1917_s14, %s1919_s12, %s1702_s13, %s1702_s13, %s1703_s15  }
  0x74   : > { %p2132_p9 = scmp.ne.s32.totalorder %s2126_s9, 0 }
  0x75   : > { %s1953_s17 = sand.u32 (!%p2132_p9), 1, %s1689_s25   ;;  %p2133_p0 = scmp.ne.s32.totalorder (!%p2132_p9), %s2123_s30, 0 }
  0x76   : > { %292 = sbr.rel (%p2132_p9) target bundleno = 862 (0x35e), region = 48  ;;  %s1037_s23 = sshll.u32 (!%p2132_p9), %s1953_s17, 7 }
  0x77   : > { %s295_s11 = scalar_lea.sflag (!%p2132_p9), [#allocation3], %s1953_s17  ;;  %s1959_s8 = scalar_lea.vmem (!%p2132_p9), [#allocation2], %s1037_s23 }
  0x7d   : > { %1668 = dma.done.wait (%p2133_p0), %s295_s11, 2048  }
  0x7e   : > { %1670 = vsyncadd (%p2133_p0), %s295_s11, 4294965248  ;;  %p2134_p11 = scmp.eq.s32.totalorder %s1769_s28, 0 }
  0x80   : > { %1672 = dma.done.wait (%p2134_p11), [#allocation6], 4096   ;;  %p2135_p8 = pmov %p2134_p11 }
  0x82   : > { %1674 = vsyncadd (%p2135_p8), [#allocation6], 4294963200  ;;  %p2136_p13 = pmov %p2135_p8 }
  0x83   : > { %p2137_p6 = pmov %p2135_p8 }
  0x84   : > { %1676 = dma.done.wait (%p2136_p13), [#allocation9], 2048  }
  0x85   : > { %1678 = vsyncadd (%p2137_p6), [#allocation9], 4294965248  ;;  %v359_v0 = vld [vmem:[#allocation5] sm:$0xff]  ;;  %v360_v1 = vld [vmem:[#allocation5 + $0x8] sm:$0xff]  ;;  %s2042_s12 = scalar_lea.vmem [#allocation10], %s1037_s23  ;;  %s1051_s20 = sshll.u32 %s1769_s28, 11 }
  0x86   : > { %v361_v2 = vld [vmem:[#allocation5 + $0x10] sm:$0xff]  ;;  %v1316_v3 = vpack.c.bf16 %v360_v1, %v359_v0  ;;  %v362_v4 = vld [vmem:[#allocation5 + $0x18] sm:$0xff]  ;;  %v363_v6 = vld [vmem:[#allocation5 + $0x20] sm:$0xff]  ;;  %s925_s21 = sshll.u32 %s2042_s12, 4  ;;  %s2063_s23 = scalar_lea.hbm %s2118_s7, %s1051_s20  ;;  %s2065_s21 = int_to_ptr.vmem [resolvable:$true] %s925_s21 }
  0x87   : > { %v1320_v5 = vpack.c.bf16 %v362_v4, %v361_v2  ;;  %v364_v7 = vld [vmem:[#allocation5 + $0x28] sm:$0xff]  ;;  %v343_v9 = vld [vmem:[%s1959_s8] sm:$0xff]  ;;  %v365_v10 = vld [vmem:[#allocation5 + $0x30] sm:$0xff]  ;;  %s912_s28 = scalar_lea.sflag [#allocation4], %s1953_s17  ;;  %s1623_s11 = scalar_lea.vmem %s2065_s21, 2048 }
  0x88   : > { %1317 = vmatprep.subr.bf16.mxu0 %v1316_v3  ;;  %v1324_v8 = vpack.c.bf16 %v364_v7, %v363_v6  ;;  %v366_v11 = vld [vmem:[#allocation5 + $0x38] sm:$0xff]  ;;  %1180 = vmatprep.mubr.f32.mxu0 %v343_v9  ;;  %v367_v13 = vld [vmem:[#allocation5 + $0x40] sm:$0xff]  ;;  %v368_v14 = vld [vmem:[#allocation5 + $0x48] sm:$0xff]  ;;  %p1624_p10 = scmp.ne.s32.totalorder %s2065_s21, %s1623_s11 }
  0x89   : > { %1319 = vmatpush3.bf16.msra.mxu0 %v1316_v3  ;;  %v1328_v12 = vpack.c.bf16 %v366_v11, %v365_v10  ;;  %v543_v15 = vld [vmem:[#allocation7] sm:$0xff]  ;;  %v544_v16 = vld [vmem:[#allocation7 + $0x8] sm:$0xff]  ;;  %v545_v17 = vld [vmem:[#allocation7 + $0x10] sm:$0xff]  ;;  %v1332_v21 = vpack.c.bf16 %v368_v14, %v367_v13 }
  0x8a   : > { %1321 = vmatprep.subr.bf16.mxu0 %v1320_v5  ;;  %v546_v18 = vld [vmem:[#allocation7 + $0x18] sm:$0xff]  ;;  %v1348_v19 = vpack.c.bf16 %v544_v16, %v543_v15  ;;  %v547_v22 = vld [vmem:[#allocation7 + $0x20] sm:$0xff]  ;;  %v548_v23 = vld [vmem:[#allocation7 + $0x28] sm:$0xff]  ;;  %p1625_p3 = pnand %p1624_p10, %p1902_p5 }
  0x8b   : > { %v1352_v20 = vpack.c.bf16 %v546_v18, %v545_v17  ;;  %v369_v24 = vld [vmem:[#allocation5 + $0x50] sm:$0xff]  ;;  %v370_v25 = vld [vmem:[#allocation5 + $0x58] sm:$0xff]  ;;  %v1356_v26 = vpack.c.bf16 %v548_v23, %v547_v22  ;;  %v371_v30 = vld [vmem:[#allocation5 + $0x60] sm:$0xff] }
  0x8c   : > { %1349 = vmatprep.subr.bf16.mxu1 %v1348_v19  ;;  %v1336_v27 = vpack.c.bf16 %v370_v25, %v369_v24  ;;  %v549_v28 = vld [vmem:[#allocation7 + $0x30] sm:$0xff]  ;;  %v550_v29 = vld [vmem:[#allocation7 + $0x38] sm:$0xff]  ;;  %v372_v31 = vld [vmem:[#allocation5 + $0x68] sm:$0xff]  ;;  %p1626_p7 = pneg %p1625_p3 }
  0x8d   : > { %1323 = vmatpush3.bf16.msra.mxu0 %v1320_v5  ;;  %1351 = vmatpush3.bf16.msra.mxu1 %v1348_v19  ;;  %v1360_v32 = vpack.c.bf16 %v550_v29, %v549_v28  ;;  %v1340_v33 = vpack.c.bf16 %v372_v31, %v371_v30  ;;  %v551_v34 = vld [vmem:[#allocation7 + $0x40] sm:$0xff]  ;;  %v552_v35 = vld [vmem:[#allocation7 + $0x48] sm:$0xff]  ;;  %v373_v36 = vld [vmem:[#allocation5 + $0x70] sm:$0xff] }
  0x8e   : > { %1325 = vmatprep.subr.bf16.mxu0 %v1324_v8  ;;  %1353 = vmatprep.subr.bf16.mxu1 %v1352_v20  ;;  %v374_v37 = vld [vmem:[#allocation5 + $0x78] sm:$0xff]  ;;  %v1364_v38 = vpack.c.bf16 %v552_v35, %v551_v34  ;;  %v553_v40 = vld [vmem:[#allocation7 + $0x50] sm:$0xff]  ;;  %v555_v43 = vld [vmem:[#allocation7 + $0x60] sm:$0xff] }
  0x8f   : > { %v1344_v39 = vpack.c.bf16 %v374_v37, %v373_v36  ;;  %v554_v41 = vld [vmem:[#allocation7 + $0x58] sm:$0xff]  ;;  %v556_v44 = vld [vmem:[#allocation7 + $0x68] sm:$0xff]  ;;  %v345_v47 = vld [vmem:[%s1959_s8 + $0x10] sm:$0xff] }
  0x90   : > { %v1368_v42 = vpack.c.bf16 %v554_v41, %v553_v40  ;;  %v344_v45 = vld [vmem:[%s1959_s8 + $0x8] sm:$0xff]  ;;  %v1372_v46 = vpack.c.bf16 %v556_v44, %v555_v43  ;;  %v346_v48 = vld [vmem:[%s1959_s8 + $0x18] sm:$0xff]  ;;  %v347_v49 = vld [vmem:[%s1959_s8 + $0x20] sm:$0xff] }
  0x91   : > { %1327 = vmatpush3.bf16.msra.mxu0 %v1324_v8  ;;  %1355 = vmatpush3.bf16.msra.mxu1 %v1352_v20  ;;  %v348_v50 = vld [vmem:[%s1959_s8 + $0x28] sm:$0xff]  ;;  %v349_v51 = vld [vmem:[%s1959_s8 + $0x30] sm:$0xff]  ;;  %v350_v52 = vld [vmem:[%s1959_s8 + $0x38] sm:$0xff] }
  0x92   : > { %1329 = vmatprep.subr.bf16.mxu0 %v1328_v12  ;;  %1357 = vmatprep.subr.bf16.mxu1 %v1356_v26  ;;  %v351_v53 = vld [vmem:[%s1959_s8 + $0x40] sm:$0xff]  ;;  %v352_v54 = vld [vmem:[%s1959_s8 + $0x48] sm:$0xff]  ;;  %v353_v55 = vld [vmem:[%s1959_s8 + $0x50] sm:$0xff] }
  0x93   : > { %v354_v56 = vld [vmem:[%s1959_s8 + $0x58] sm:$0xff]  ;;  %v355_v57 = vld [vmem:[%s1959_s8 + $0x60] sm:$0xff]  ;;  %v356_v58 = vld [vmem:[%s1959_s8 + $0x68] sm:$0xff] }
  0x94   : > { %v357_v59 = vld [vmem:[%s1959_s8 + $0x70] sm:$0xff]  ;;  %v358_v60 = vld [vmem:[%s1959_s8 + $0x78] sm:$0xff]  ;;  %v727_v0 = vld [vmem:[#allocation8] sm:$0xff]  ;;  %s1705_s8 = smov [#allocation10]  }
  0x95   : > { %1331 = vmatpush3.bf16.msra.mxu0 %v1328_v12  ;;  %1359 = vmatpush3.bf16.msra.mxu1 %v1356_v26  ;;  %v557_v61 = vld [vmem:[#allocation7 + $0x70] sm:$0xff]  ;;  %v558_v62 = vld [vmem:[#allocation7 + $0x78] sm:$0xff]  ;;  %v728_v1 = vld [vmem:[#allocation8 + $0x8] sm:$0xff]  ;;  %s1627_s30 = sshll.u32 %s1705_s8, 4  ;;  %s1628_s30 = int_to_ptr.vmem [resolvable:$false] %s1627_s30 }
  0x96   : > { %1333 = vmatprep.subr.bf16.mxu0 %v1332_v21  ;;  %1361 = vmatprep.subr.bf16.mxu1 %v1360_v32  ;;  %v1376_v63 = vpack.c.bf16 %v558_v62, %v557_v61  ;;  %v729_v2 = vld [vmem:[#allocation8 + $0x10] sm:$0xff]  ;;  %v1380_v3 = vpack.c.bf16 %v728_v1, %v727_v0  ;;  %v730_v4 = vld [vmem:[#allocation8 + $0x18] sm:$0xff]  ;;  %v731_v6 = vld [vmem:[#allocation8 + $0x20] sm:$0xff]  ;;  %s1629_s9 = scalar_lea.vmem %s1628_s30, 4096  ;;  %p1630_p12 = scmp.lt.s32.totalorder %s2065_s21, %s1628_s30 }
  0x97   : > { %v1384_v5 = vpack.c.bf16 %v730_v4, %v729_v2  ;;  %v732_v7 = vld [vmem:[#allocation8 + $0x28] sm:$0xff]  ;;  %v733_v9 = vld [vmem:[#allocation8 + $0x30] sm:$0xff]  ;;  %v734_v10 = vld [vmem:[#allocation8 + $0x38] sm:$0xff]  ;;  %p1631_p1 = scmp.lt.s32.totalorder %s1629_s9, %s1623_s11 }
  0x98   : > { %v1388_v8 = vpack.c.bf16 %v732_v7, %v731_v6  ;;  %v1989_v11 = vpack.c.bf16 %v734_v10, %v733_v9  ;;  %v735_v12 = vld [vmem:[#allocation8 + $0x40] sm:$0xff]  ;;  %v736_v13 = vld [vmem:[#allocation8 + $0x48] sm:$0xff]  ;;  %v737_v15 = vld [vmem:[#allocation8 + $0x50] sm:$0xff] }
  0x99   : > { %1335 = vmatpush3.bf16.msra.mxu0 %v1332_v21  ;;  %1363 = vmatpush3.bf16.msra.mxu1 %v1360_v32  ;;  %v1992_v14 = vpack.c.bf16 %v736_v13, %v735_v12  ;;  %v738_v16 = vld [vmem:[#allocation8 + $0x58] sm:$0xff]  ;;  %v739_v18 = vld [vmem:[#allocation8 + $0x60] sm:$0xff]  ;;  %v740_v19 = vld [vmem:[#allocation8 + $0x68] sm:$0xff]  ;;  %p1632_p2 = por %p1631_p1, %p1630_p12 }
  0x9a   : > { %1337 = vmatprep.subr.bf16.mxu0 %v1336_v27  ;;  %1365 = vmatprep.subr.bf16.mxu1 %v1364_v38  ;;  %v1996_v17 = vpack.c.bf16 %v738_v16, %v737_v15  ;;  %v2000_v20 = vpack.c.bf16 %v740_v19, %v739_v18  ;;  %v2008_v21 = vld [vmem:[%s2113_s2] ss:$0 sm:$0xff]  ;;  %v741_v6 = vld [vmem:[#allocation8 + $0x70] sm:$0xff]  ;;  %v742_v7 = vld [vmem:[#allocation8 + $0x78] sm:$0xff] }
  0x9b   : > { %v1043_v9 = vld [vmem:[%s2115_s4] ss:$0 sm:$0xff]  ;;  %p1633_p4 = pnand %p1632_p2, %p1626_p7 }
  0x9d   : > { %1339 = vmatpush3.bf16.msra.mxu0 %v1336_v27  ;;  %1367 = vmatpush3.bf16.msra.mxu1 %v1364_v38 }
  0x9e   : > { %1341 = vmatprep.subr.bf16.mxu0 %v1340_v33  ;;  %1369 = vmatprep.subr.bf16.mxu1 %v1368_v42 }
  0xa1   : > { %1343 = vmatpush3.bf16.msra.mxu0 %v1340_v33  ;;  %1371 = vmatpush3.bf16.msra.mxu1 %v1368_v42 }
  0xa2   : > { %1345 = vmatprep.subr.bf16.mxu0 %v1344_v39  ;;  %1373 = vmatprep.subr.bf16.mxu1 %v1372_v46 }
  0xa5   : > { %1347 = vmatpush3.bf16.msra.mxu0 %v1344_v39  ;;  %1375 = vmatpush3.bf16.msra.mxu1 %v1372_v46 }
  0xa6   : > { %1377 = vmatprep.subr.bf16.mxu1 %v1376_v63  ;;  %1381 = vmatprep.subr.bf16.mxu0 %v1380_v3 }
  0xa8   : > { %1181 = vmatmul.mubr.f32.vlgmr.msra.gmra.mrb[0].mxu0 %v344_v45 }
  0xa9   : > { %1183 = vmatprep.mubr.f32.mxu0 %v345_v47  ;;  %1379 = vmatpush3.bf16.msra.mxu1 %v1376_v63 }
  0xaa   : > { %1412 = vmatprep.subr.bf16.mxu1 %v1380_v3  ;;  %1383 = vmatpush3.bf16.msra.mxu0 %v1380_v3 }
  0xab   : > { %1385 = vmatprep.subr.bf16.mxu0 %v1384_v5 }
  0xac   : > { %1184 = vmatmul.mubr.f32.gmra.mrb[2].mxu0 %v346_v48 }
  0xad   : > { %1186 = vmatprep.mubr.f32.mxu0 %v347_v49 }
  0xae   : > { %1387 = vmatpush3.bf16.msra.mxu0 %v1384_v5 }
  0xaf   : > { %1389 = vmatprep.subr.bf16.mxu0 %v1388_v8 }
  0xb0   : > { %1187 = vmatmul.mubr.f32.gmra.mrb[4].mxu0 %v348_v50 }
  0xb1   : > { %1189 = vmatprep.mubr.f32.mxu0 %v349_v51 }
  0xb2   : > { %1391 = vmatpush3.bf16.msra.mxu0 %v1388_v8 }
  0xb3   : > { %1393 = vmatprep.subr.bf16.mxu0 %v1989_v11 }
  0xb4   : > { %1190 = vmatmul.mubr.f32.gmra.mrb[6].mxu0 %v350_v52 }
  0xb5   : > { %1192 = vmatprep.mubr.f32.mxu0 %v351_v53 }
  0xb6   : > { %1395 = vmatpush3.bf16.msra.mxu0 %v1989_v11 }
  0xb7   : > { %1397 = vmatprep.subr.bf16.mxu0 %v1992_v14 }
  0xb8   : > { %1193 = vmatmul.mubr.f32.gmra.mrb[8].mxu0 %v352_v54 }
  0xb9   : > { %1195 = vmatprep.mubr.f32.mxu0 %v353_v55 }
  0xba   : > { %1399 = vmatpush3.bf16.msra.mxu0 %v1992_v14 }
  0xbb   : > { %1401 = vmatprep.subr.bf16.mxu0 %v1996_v17 }
  0xbc   : > { %1196 = vmatmul.mubr.f32.gmra.mrb[10].mxu0 %v354_v56 }
  0xbd   : > { %1198 = vmatprep.mubr.f32.mxu0 %v355_v57 }
  0xbe   : > { %1403 = vmatpush3.bf16.msra.mxu0 %v1996_v17 }
  0xbf   : > { %1405 = vmatprep.subr.bf16.mxu0 %v2000_v20 }
  0xc0   : > { %1199 = vmatmul.mubr.f32.gmra.mrb[12].mxu0 %v356_v58 }
  0xc1   : > { %1201 = vmatprep.mubr.f32.mxu0 %v357_v59 }
  0xc2   : > { %1407 = vmatpush3.bf16.msra.mxu0 %v2000_v20 }
  0xc4   : > { %1202 = vmatmul.mubr.f32.gmra.mrb[14].mxu0 %v358_v60 }
 0x17b   : > { %v1182_v22 = vpop.f32.mrb[0].mxu0 }
 0x17c   : > { %v454_v23 = vadd.f32 %v1182_v22, %v2008_v21  ;;  %v448_v24 = vpop.f32.mrb[1].mxu0 }
 0x17d   : > { %v449_v25 = vadd.f32 %v2008_v21, %v448_v24 }
 0x17e   : > { %v528_v28 = vmax.f32 %v454_v23, 0.0 }
 0x17f   : > { %v1185_v26 = vpop.f32.mrb[2].mxu0  ;;  %v527_v27 = vmax.f32 %v449_v25, 0.0 }
 0x180   : > { %v464_v29 = vadd.f32 %v1185_v26, %v2008_v21  ;;  %v458_v30 = vpop.f32.mrb[3].mxu0 }
 0x181   : > { %v459_v31 = vadd.f32 %v2008_v21, %v458_v30  ;;  %1236 = vmatprep.mubr.f32.mxu1 %v527_v27 }
 0x182   : > { %1237 = vmatmul.mubr.f32.vlgmr.msra.gmra.mrb[0].mxu1 %v528_v28  ;;  %v530_v34 = vmax.f32 %v464_v29, 0.0 }
 0x183   : > { %v529_v32 = vmax.f32 %v459_v31, 0.0  ;;  %v1188_v33 = vpop.f32.mrb[4].mxu0  ;;  %1420 = vmatpush3.bf16.msra.mxu1 %v1380_v3 }
 0x184   : > { %v474_v35 = vadd.f32 %v1188_v33, %v2008_v21  ;;  %v468_v36 = vpop.f32.mrb[5].mxu0  ;;  %1413 = vmatprep.subr.bf16.mxu1 %v1384_v5 }
 0x185   : > { %v469_v37 = vadd.f32 %v2008_v21, %v468_v36  ;;  %1239 = vmatprep.mubr.f32.mxu1 %v529_v32 }
 0x186   : > { %1240 = vmatmul.mubr.f32.gmra.mrb[2].mxu1 %v530_v34  ;;  %v532_v40 = vmax.f32 %v474_v35, 0.0 }
 0x187   : > { %v531_v38 = vmax.f32 %v469_v37, 0.0  ;;  %v1191_v39 = vpop.f32.mrb[6].mxu0  ;;  %1421 = vmatpush3.bf16.msra.mxu1 %v1384_v5 }
 0x188   : > { %v484_v41 = vadd.f32 %v1191_v39, %v2008_v21  ;;  %v478_v42 = vpop.f32.mrb[7].mxu0  ;;  %1414 = vmatprep.subr.bf16.mxu1 %v1388_v8 }
 0x189   : > { %v479_v43 = vadd.f32 %v2008_v21, %v478_v42  ;;  %1242 = vmatprep.mubr.f32.mxu1 %v531_v38 }
 0x18a   : > { %1243 = vmatmul.mubr.f32.gmra.mrb[4].mxu1 %v532_v40  ;;  %v534_v46 = vmax.f32 %v484_v41, 0.0 }
 0x18b   : > { %v533_v44 = vmax.f32 %v479_v43, 0.0  ;;  %v1194_v45 = vpop.f32.mrb[8].mxu0  ;;  %1422 = vmatpush3.bf16.msra.mxu1 %v1388_v8  ;;  %v1408_v8 = vpack.c.bf16 %v742_v7, %v741_v6 }
 0x18c   : > { %v494_v47 = vadd.f32 %v1194_v45, %v2008_v21  ;;  %v488_v48 = vpop.f32.mrb[9].mxu0  ;;  %1415 = vmatprep.subr.bf16.mxu1 %v1989_v11 }
 0x18d   : > { %v489_v49 = vadd.f32 %v2008_v21, %v488_v48  ;;  %1245 = vmatprep.mubr.f32.mxu1 %v533_v44  ;;  %1409 = vmatprep.subr.bf16.mxu0 %v1408_v8 }
 0x18e   : > { %1246 = vmatmul.mubr.f32.gmra.mrb[6].mxu1 %v534_v46  ;;  %v536_v52 = vmax.f32 %v494_v47, 0.0  ;;  %1411 = vmatpush3.bf16.msra.mxu0 %v1408_v8 }
 0x18f   : > { %v535_v50 = vmax.f32 %v489_v49, 0.0  ;;  %v1197_v51 = vpop.f32.mrb[10].mxu0  ;;  %1423 = vmatpush3.bf16.msra.mxu1 %v1989_v11 }
 0x190   : > { %v504_v53 = vadd.f32 %v1197_v51, %v2008_v21  ;;  %v498_v54 = vpop.f32.mrb[11].mxu0  ;;  %1416 = vmatprep.subr.bf16.mxu1 %v1992_v14 }
 0x191   : > { %v499_v55 = vadd.f32 %v2008_v21, %v498_v54  ;;  %1248 = vmatprep.mubr.f32.mxu1 %v535_v50 }
 0x192   : > { %1249 = vmatmul.mubr.f32.gmra.mrb[8].mxu1 %v536_v52  ;;  %v538_v58 = vmax.f32 %v504_v53, 0.0 }
 0x193   : > { %v537_v56 = vmax.f32 %v499_v55, 0.0  ;;  %v1200_v57 = vpop.f32.mrb[12].mxu0  ;;  %1424 = vmatpush3.bf16.msra.mxu1 %v1992_v14 }
 0x194   : > { %v514_v59 = vadd.f32 %v1200_v57, %v2008_v21  ;;  %v508_v60 = vpop.f32.mrb[13].mxu0  ;;  %1417 = vmatprep.subr.bf16.mxu1 %v1996_v17 }
 0x195   : > { %v509_v61 = vadd.f32 %v2008_v21, %v508_v60  ;;  %1251 = vmatprep.mubr.f32.mxu1 %v537_v56 }
 0x196   : > { %1252 = vmatmul.mubr.f32.gmra.mrb[10].mxu1 %v538_v58  ;;  %v540_v0 = vmax.f32 %v514_v59, 0.0  ;;  %v1044_v58 = vld [vmem:[%s2117_s6] ss:$0 sm:$0xff] }
 0x197   : > { %v539_v62 = vmax.f32 %v509_v61, 0.0  ;;  %v1203_v63 = vpop.f32.mrb[14].mxu0  ;;  %1425 = vmatpush3.bf16.msra.mxu1 %v1996_v17 }
 0x198   : > { %v524_v1 = vadd.f32 %v1203_v63, %v2008_v21  ;;  %v518_v2 = vpop.f32.mrb[15].mxu0  ;;  %1418 = vmatprep.subr.bf16.mxu1 %v2000_v20 }
 0x199   : > { %v519_v3 = vadd.f32 %v2008_v21, %v518_v2  ;;  %1254 = vmatprep.mubr.f32.mxu1 %v539_v62 }
 0x19a   : > { %1255 = vmatmul.mubr.f32.gmra.mrb[12].mxu1 %v540_v0  ;;  %v542_v5 = vmax.f32 %v524_v1, 0.0 }
 0x19b   : > { %v541_v4 = vmax.f32 %v519_v3, 0.0  ;;  %1426 = vmatpush3.bf16.msra.mxu1 %v2000_v20 }
 0x19c   : > { %1419 = vmatprep.subr.bf16.mxu1 %v1408_v8 }
 0x19d   : > { %1257 = vmatprep.mubr.f32.mxu1 %v541_v4 }
 0x19e   : > { %1258 = vmatmul.mubr.f32.gmra.mrb[14].mxu1 %v542_v5 }
 0x19f   : > { %1427 = vmatpush3.bf16.msra.mxu1 %v1408_v8 }
 0x255   : > { %v1238_v10 = vpop.f32.mrb[0].mxu1 }
 0x256   : > { %v638_v11 = vadd.f32 %v1238_v10, %v1043_v9  ;;  %v632_v12 = vpop.f32.mrb[1].mxu1 }
 0x257   : > { %v633_v13 = vadd.f32 %v1043_v9, %v632_v12 }
 0x258   : > { %v712_v16 = vmax.f32 %v638_v11, 0.0 }
 0x259   : > { %v711_v14 = vmax.f32 %v633_v13, 0.0  ;;  %v1241_v15 = vpop.f32.mrb[2].mxu1 }
 0x25a   : > { %v648_v17 = vadd.f32 %v1241_v15, %v1043_v9  ;;  %v642_v18 = vpop.f32.mrb[3].mxu1 }
 0x25b   : > { %v643_v19 = vadd.f32 %v1043_v9, %v642_v18  ;;  %1292 = vmatprep.mubr.f32.mxu0 %v711_v14 }
 0x25c   : > { %1293 = vmatmul.mubr.f32.vlgmr.msra.gmra.mrb[16].mxu0 %v712_v16  ;;  %v714_v22 = vmax.f32 %v648_v17, 0.0 }
 0x25d   : > { %v713_v20 = vmax.f32 %v643_v19, 0.0  ;;  %v1244_v21 = vpop.f32.mrb[4].mxu1 }
 0x25e   : > { %v658_v23 = vadd.f32 %v1244_v21, %v1043_v9  ;;  %v652_v24 = vpop.f32.mrb[5].mxu1 }
 0x25f   : > { %v653_v25 = vadd.f32 %v1043_v9, %v652_v24  ;;  %1295 = vmatprep.mubr.f32.mxu0 %v713_v20 }
 0x260   : > { %1296 = vmatmul.mubr.f32.gmra.mrb[18].mxu0 %v714_v22  ;;  %v716_v28 = vmax.f32 %v658_v23, 0.0 }
 0x261   : > { %v715_v26 = vmax.f32 %v653_v25, 0.0  ;;  %v1247_v27 = vpop.f32.mrb[6].mxu1 }
 0x262   : > { %v668_v29 = vadd.f32 %v1247_v27, %v1043_v9  ;;  %v662_v30 = vpop.f32.mrb[7].mxu1 }
 0x263   : > { %v663_v31 = vadd.f32 %v1043_v9, %v662_v30  ;;  %1298 = vmatprep.mubr.f32.mxu0 %v715_v26 }
 0x264   : > { %1299 = vmatmul.mubr.f32.gmra.mrb[20].mxu0 %v716_v28  ;;  %v718_v34 = vmax.f32 %v668_v29, 0.0 }
 0x265   : > { %v717_v32 = vmax.f32 %v663_v31, 0.0  ;;  %v1250_v33 = vpop.f32.mrb[8].mxu1 }
 0x266   : > { %v678_v35 = vadd.f32 %v1250_v33, %v1043_v9  ;;  %v672_v36 = vpop.f32.mrb[9].mxu1 }
 0x267   : > { %v673_v37 = vadd.f32 %v1043_v9, %v672_v36  ;;  %1301 = vmatprep.mubr.f32.mxu0 %v717_v32 }
 0x268   : > { %1302 = vmatmul.mubr.f32.gmra.mrb[22].mxu0 %v718_v34  ;;  %v720_v40 = vmax.f32 %v678_v35, 0.0 }
 0x269   : > { %v719_v38 = vmax.f32 %v673_v37, 0.0  ;;  %v1253_v39 = vpop.f32.mrb[10].mxu1 }
 0x26a   : > { %v688_v41 = vadd.f32 %v1253_v39, %v1043_v9  ;;  %v682_v42 = vpop.f32.mrb[11].mxu1 }
 0x26b   : > { %v683_v43 = vadd.f32 %v1043_v9, %v682_v42  ;;  %1304 = vmatprep.mubr.f32.mxu1 %v719_v38 }
 0x26c   : > { %1305 = vmatmul.mubr.f32.vlgmr.msra.gmra.mrb[16].mxu1 %v720_v40  ;;  %v722_v46 = vmax.f32 %v688_v41, 0.0 }
 0x26d   : > { %v721_v44 = vmax.f32 %v683_v43, 0.0  ;;  %v1256_v45 = vpop.f32.mrb[12].mxu1 }
 0x26e   : > { %v698_v47 = vadd.f32 %v1256_v45, %v1043_v9  ;;  %v692_v48 = vpop.f32.mrb[13].mxu1 }
 0x26f   : > { %v693_v49 = vadd.f32 %v1043_v9, %v692_v48  ;;  %1307 = vmatprep.mubr.f32.mxu1 %v721_v44 }
 0x270   : > { %1308 = vmatmul.mubr.f32.gmra.mrb[18].mxu1 %v722_v46  ;;  %v724_v52 = vmax.f32 %v698_v47, 0.0 }
 0x271   : > { %v723_v50 = vmax.f32 %v693_v49, 0.0  ;;  %v1259_v51 = vpop.f32.mrb[14].mxu1 }
 0x272   : > { %v708_v53 = vadd.f32 %v1259_v51, %v1043_v9  ;;  %v702_v54 = vpop.f32.mrb[15].mxu1 }
 0x273   : > { %v703_v55 = vadd.f32 %v1043_v9, %v702_v54  ;;  %1310 = vmatprep.mubr.f32.mxu1 %v723_v50 }
 0x274   : > { %1311 = vmatmul.mubr.f32.gmra.mrb[20].mxu1 %v724_v52  ;;  %v726_v57 = vmax.f32 %v708_v53, 0.0 }
 0x275   : > { %v725_v56 = vmax.f32 %v703_v55, 0.0 }
 0x277   : > { %1313 = vmatprep.mubr.f32.mxu1 %v725_v56 }
 0x278   : > { %1314 = vmatmul.mubr.f32.gmra.mrb[22].mxu1 %v726_v57 }
 0x32f   : > { %v1294_v59 = vpop.f32.mrb[16].mxu0 }
 0x330   : > { %v822_v60 = vadd.f32 %v1294_v59, %v1044_v58  ;;  %v816_v61 = vpop.f32.mrb[17].mxu0 }
 0x331   : > { %v817_v62 = vadd.f32 %v1044_v58, %v816_v61 }
 0x332   : > { %896 = vst [vmem:[%s2042_s12 + $0x8] sm:$0xff] %v822_v60 }
 0x333   : > { %895 = vst [vmem:[%s2042_s12] sm:$0xff] %v817_v62  ;;  %v1297_v63 = vpop.f32.mrb[18].mxu0 }
 0x334   : > { %v832_v0 = vadd.f32 %v1297_v63, %v1044_v58  ;;  %v826_v1 = vpop.f32.mrb[19].mxu0 }
 0x335   : > { %v827_v2 = vadd.f32 %v1044_v58, %v826_v1 }
 0x336   : > { %898 = vst [vmem:[%s2042_s12 + $0x18] sm:$0xff] %v832_v0 }
 0x337   : > { %897 = vst [vmem:[%s2042_s12 + $0x10] sm:$0xff] %v827_v2  ;;  %v1300_v3 = vpop.f32.mrb[20].mxu0 }
 0x338   : > { %v842_v4 = vadd.f32 %v1300_v3, %v1044_v58  ;;  %v836_v5 = vpop.f32.mrb[21].mxu0 }
 0x339   : > { %v837_v6 = vadd.f32 %v1044_v58, %v836_v5 }
 0x33a   : > { %900 = vst [vmem:[%s2042_s12 + $0x28] sm:$0xff] %v842_v4 }
 0x33b   : > { %899 = vst [vmem:[%s2042_s12 + $0x20] sm:$0xff] %v837_v6  ;;  %v1303_v7 = vpop.f32.mrb[22].mxu0 }
 0x33c   : > { %v852_v8 = vadd.f32 %v1303_v7, %v1044_v58  ;;  %v846_v9 = vpop.f32.mrb[23].mxu0 }
 0x33d   : > { %v847_v10 = vadd.f32 %v1044_v58, %v846_v9 }
 0x33e   : > { %902 = vst [vmem:[%s2042_s12 + $0x38] sm:$0xff] %v852_v8 }
 0x33f   : > { %901 = vst [vmem:[%s2042_s12 + $0x30] sm:$0xff] %v847_v10  ;;  %v1306_v11 = vpop.f32.mrb[16].mxu1 }
 0x340   : > { %v862_v12 = vadd.f32 %v1306_v11, %v1044_v58  ;;  %v856_v13 = vpop.f32.mrb[17].mxu1 }
 0x341   : > { %v857_v14 = vadd.f32 %v1044_v58, %v856_v13 }
 0x342   : > { %904 = vst [vmem:[%s2042_s12 + $0x48] sm:$0xff] %v862_v12 }
 0x343   : > { %903 = vst [vmem:[%s2042_s12 + $0x40] sm:$0xff] %v857_v14  ;;  %v1309_v15 = vpop.f32.mrb[18].mxu1 }
 0x344   : > { %v872_v16 = vadd.f32 %v1309_v15, %v1044_v58  ;;  %v866_v17 = vpop.f32.mrb[19].mxu1 }
 0x345   : > { %v867_v18 = vadd.f32 %v1044_v58, %v866_v17 }
 0x346   : > { %906 = vst [vmem:[%s2042_s12 + $0x58] sm:$0xff] %v872_v16 }
 0x347   : > { %905 = vst [vmem:[%s2042_s12 + $0x50] sm:$0xff] %v867_v18  ;;  %v1312_v19 = vpop.f32.mrb[20].mxu1 }
 0x348   : > { %v882_v20 = vadd.f32 %v1312_v19, %v1044_v58  ;;  %v876_v21 = vpop.f32.mrb[21].mxu1 }
 0x349   : > { %v877_v22 = vadd.f32 %v1044_v58, %v876_v21 }
 0x34a   : > { %908 = vst [vmem:[%s2042_s12 + $0x68] sm:$0xff] %v882_v20 }
 0x34b   : > { %907 = vst [vmem:[%s2042_s12 + $0x60] sm:$0xff] %v877_v22  ;;  %v1315_v23 = vpop.f32.mrb[22].mxu1 }
 0x34c   : > { %v892_v24 = vadd.f32 %v1315_v23, %v1044_v58  ;;  %v886_v25 = vpop.f32.mrb[23].mxu1 }
 0x34d   : > { %v887_v26 = vadd.f32 %v1044_v58, %v886_v25 }
 0x34e   : > { %910 = vst [vmem:[%s2042_s12 + $0x78] sm:$0xff] %v892_v24 }
 0x34f   : > { %909 = vst [vmem:[%s2042_s12 + $0x70] sm:$0xff] %v887_v26 }
 0x350   : > { %1636 = shalt.err (!%p1633_p4)
}
 0x351   : > { %s1637_s13 = scalar_lea.hbm %s2063_s23, 2048  ;;  %s1641_s14 = scalar_lea.hbm %s2118_s7, 4096 }
 0x352   : > { %p1638_p9 = scmp.ne.s32.totalorder %s2063_s23, %s1637_s13  ;;  %p1642_p8 = scmp.lt.u32.totalorder %s2063_s23, %s2118_s7 }
 0x353   : > { %p1643_p13 = scmp.lt.u32.totalorder %s1641_s14, %s1637_s13  ;;  %p1645_p10 = scmp.lt.u32.totalorder %s1637_s13, %s2063_s23 }
 0x354   : > { %p1639_p0 = pnand %p1638_p9, %p1902_p5 }
 0x355   : > { %p1644_p6 = por %p1643_p13, %p1642_p8 }
 0x356   : > { %p1640_p11 = pneg %p1639_p0 }
 0x357   : > { %p1646_p3 = por %p1645_p10, %p1644_p6 }
 0x359   : > { %p1647_p7 = pnand %p1646_p3, %p1640_p11 }
 0x35b   : > { %1650 = shalt.err (!%p1647_p7)
}
 0x35c   : > { %s1706_s16 = smov 128   ;;  %s1707_s29 = smov 8  }
 0x35d   : > { %1442 = dma.vmem_to_hbm [thread:$0]  (%p1902_p5), %s2065_s21, 2048, %s2063_s23, %s912_s28, %s1706_s16, %s1706_s16, %s1707_s29  }
 0x35e PF: > { %s2138_s11 = sld [smem:[#allocation15_spill]]  ;;  %s940_s8 = sand.u32 1, %s1685_s24  }
 0x35f   : > { %p2140_p1 = scmp.ge.s32.totalorder %s1697_s27, 2  ;;  %s941_s30 = scalar_lea.sflag [#allocation4], %s940_s8 }
 0x364   : > { %p2139_p12 = scmp.ne.s32.totalorder %s2138_s11, 0 }
 0x366   : > { %p1459_p2 = pnand %p2140_p1, %p2139_p12 }
 0x368   : > { %1680 = dma.done.wait (!%p1459_p2), %s941_s30, 2048  }
 0x369   : > { %1682 = vsyncadd (!%p1459_p2), %s941_s30, 4294965248  ;;  %p22_p4 = scmp.ge.s32.totalorder %s1888_s22, 4   ;;  %s2141_s24 = smov %s1689_s25 }
 0x36a   : > { %s2142_s25 = smov %s1693_s26  ;;  %s2143_s26 = smov %s1898_s18 }
 0x36b   : > { %s2144_s27 = smov %s1888_s22  ;;  %24 = sbr.rel (!%p22_p4) target bundleno = 7 (0x7), region = 105 }
 0x372   :  { %946 = vsyncpa [#allocation3], 1 }
 0x373   :  { %948 = vsyncpa [#allocation3 + $0x1], 1 }
 0x374   :  { %949 = vsyncpa [#allocation6], 1 }
 0x375   :  { %950 = vsyncpa [#allocation9], 1 }
 0x376   :  { %951 = vsyncpa [#allocation4], 1 }
 0x377   :  { %953 = vsyncpa [#allocation4 + $0x1], 1 }

</bundles_post_ra>
